<compile_context>
chip_gen: v6e
topology: v6e:2x2x1
jax: 0.10.0
libtpu: 0.0.40
codegen_flags: <defaults>
</compile_context>

<pallas_src>
import functools
import math

import jax
import jax.numpy as jnp
from jax.experimental import pallas as pl
from jax.experimental.pallas import tpu as pltpu


# -----------------------------------------------------------------------------
# Model config (scaled-down BERT)
# -----------------------------------------------------------------------------
VOCAB = 64
HIDDEN = 128
NUM_LAYERS = 2
NUM_HEADS = 2
HEAD_DIM = HIDDEN // NUM_HEADS
INTERMEDIATE = 256
MAX_POS = 16
NUM_CLASSES = 3
CLS_PAD = 128            # classifier output padded to a full 128-lane slab
LN_EPS = 1e-12

_BF16 = jnp.bfloat16


# -----------------------------------------------------------------------------
# In-kernel helpers
# -----------------------------------------------------------------------------
def _mm(a, w):
    """bf16 MXU matmul with f32 accumulation (weights are already bf16)."""
    return jnp.dot(a.astype(_BF16), w.astype(_BF16), preferred_element_type=jnp.float32)


def _layernorm(x, gamma, beta, eps):
    mu = jnp.mean(x, axis=-1, keepdims=True)
    xc = x - mu
    var = jnp.mean(xc * xc, axis=-1, keepdims=True)
    inv = jax.lax.rsqrt(var + eps)
    return xc * inv * gamma + beta


def _gelu(x):
    # tanh-approx GELU.
    # TODO(synk): exact erf-based GELU for bit-parity with HF bert-base-uncased.
    return 0.5 * x * (1.0 + jnp.tanh(0.7978845608028654 * (x + 0.044715 * x * x * x)))


# -----------------------------------------------------------------------------
# Kernel 1: embedding sum + LayerNorm (gridded over batch)
# -----------------------------------------------------------------------------
def _embed_ln_kernel(word_ref, pos_ref, tok_ref, g_ref, b_ref, o_ref, *, eps):
    x = word_ref[...] + pos_ref[...] + tok_ref[...]            # (S, H) f32
    o_ref[...] = _layernorm(x, g_ref[...], b_ref[...], eps).astype(o_ref.dtype)


def embed_layernorm(word, pos, tok, gamma, beta, B, S):
    """LN(word_emb + pos_emb + type_emb). word:(B*S,H) pos:(S,H) tok:(H,) -> (B*S,H) bf16."""
    M, H = word.shape
    return pl.pallas_call(
        functools.partial(_embed_ln_kernel, eps=LN_EPS),
        out_shape=jax.ShapeDtypeStruct((M, H), _BF16),
        grid=(B,),
        in_specs=[
            pl.BlockSpec((S, H), lambda b: (b, 0)),   # this batch's word rows
            pl.BlockSpec((S, H), lambda b: (0, 0)),   # pos emb (resident)
            pl.BlockSpec((1, H), lambda b: (0, 0)),   # type emb (token_type_ids == 0)
            pl.BlockSpec((1, H), lambda b: (0, 0)),   # LN gamma
            pl.BlockSpec((1, H), lambda b: (0, 0)),   # LN beta
        ],
        out_specs=pl.BlockSpec((S, H), lambda b: (b, 0)),
        compiler_params=pltpu.CompilerParams(dimension_semantics=("parallel",)),
    )(word, pos, tok.reshape(1, H), gamma.reshape(1, H), beta.reshape(1, H))


# -----------------------------------------------------------------------------
# Kernel 2: full encoder stack, grid=(NUM_LAYERS,), h carried in VMEM scratch
# -----------------------------------------------------------------------------
def _encoder_layer_kernel(mask_ref, h0_ref,
                          wqkv_ref, bqkv_ref, wo_ref, bo_ref, g1_ref, b1_ref,
                          wi_ref, bi_ref, wf_ref, bf_ref, g2_ref, b2_ref,
                          out_ref, h_s,
                          *, batch, seq, num_heads, head_dim, eps):
    l = pl.program_id(0)

    @pl.when(l == 0)
    def _():
        h_s[...] = h0_ref[...].astype(jnp.float32)     # seed carried state from embeddings

    H = num_heads * head_dim
    scale = 1.0 / math.sqrt(head_dim)

    h = h_s[...]                                       # (M, H) f32, resident across layers
    h_bf = h.astype(_BF16)

    # --- fused QKV projection (one (H, 3H) bf16 matmul, f32 accumulation) ---
    qkv = _mm(h_bf, wqkv_ref[0]) + bqkv_ref[0]         # (M, 3H) f32

    # --- multi-head self-attention; additive mask built in-kernel ---
    # batch/head loops are tiny static unrolls here; at real sizes batch becomes a grid axis
    # and heads a batched einsum to avoid vreg-spilling unrolls.
    ctx_rows = []
    for b in range(batch):
        qkv_b = qkv[b * seq:(b + 1) * seq].astype(_BF16)       # (S, 3H) bf16 (cast once/batch)
        add = (1.0 - mask_ref[b]) * -10000.0                   # (1, S) additive key mask
        heads = []
        for hd in range(num_heads):
            lo = hd * head_dim
            qh = qkv_b[:, lo:lo + head_dim]                    # (S, D) bf16
            kh = qkv_b[:, H + lo:H + lo + head_dim]            # (S, D) bf16
            vh = qkv_b[:, 2 * H + lo:2 * H + lo + head_dim]    # (S, D) bf16
            # QK^T via dot_general (contract last dims) -> no XLU transpose, bf16 MXU path
            s = jax.lax.dot_general(qh, kh, (((1,), (1,)), ((), ())),
                                    preferred_element_type=jnp.float32)
            s = s * scale + add
            s = s - jnp.max(s, axis=-1, keepdims=True)
            p = jnp.exp(s)
            p = p * pl.reciprocal(jnp.sum(p, axis=-1, keepdims=True), approx=True)
            heads.append(jnp.dot(p.astype(_BF16), vh,
                                 preferred_element_type=jnp.float32))          # (S, D)
        ctx_rows.append(jnp.concatenate(heads, axis=-1))                       # (S, H)
    ctx = jnp.concatenate(ctx_rows, axis=0)                                    # (M, H) f32

    # --- output projection (single K=H matmul) + residual + LN1 ---
    attn = _mm(ctx, wo_ref[0]) + bo_ref[0]
    h1 = _layernorm(h + attn, g1_ref[0], b1_ref[0], eps)

    # --- FFN + residual + LN2 (intermediate activation never leaves vregs/VMEM) ---
    inter = _gelu(_mm(h1, wi_ref[0]) + bi_ref[0])              # (M, I) f32
    ffn = _mm(inter, wf_ref[0]) + bf_ref[0]                    # (M, H) f32
    h2 = _layernorm(h1 + ffn, g2_ref[0], b2_ref[0], eps)

    h_s[...] = h2                                              # carry to next layer
    out_ref[...] = h2.astype(out_ref.dtype)                    # resident output slab


def encoder_stack(h0, mask3, params, B, S):
    """Run all encoder layers in one pallas_call; per-layer weights are streamed/prefetched."""
    M, H = h0.shape
    L = params["wqkv"].shape[0]
    H3 = 3 * H
    I = params["wi"].shape[2]

    lyr = lambda l: (l, 0, 0)        # per-layer weight block
    cst3 = lambda l: (0, 0, 0)       # constant 3-D block
    cst2 = lambda l: (0, 0)          # constant 2-D block

    grid_spec = pltpu.PrefetchScalarGridSpec(
        num_scalar_prefetch=0,
        grid=(L,),
        in_specs=[
            pl.BlockSpec((B, 1, S), cst3),       # raw attention mask
            pl.BlockSpec((M, H), cst2),          # embeddings (only consumed at l == 0)
            pl.BlockSpec((1, H, H3), lyr),       # wqkv (bf16)
            pl.BlockSpec((1, 1, H3), lyr),       # bqkv
            pl.BlockSpec((1, H, H), lyr),        # wo (bf16)
            pl.BlockSpec((1, 1, H), lyr),        # bo
            pl.BlockSpec((1, 1, H), lyr),        # ln1 gamma
            pl.BlockSpec((1, 1, H), lyr),        # ln1 beta
            pl.BlockSpec((1, H, I), lyr),        # wi (bf16)
            pl.BlockSpec((1, 1, I), lyr),        # bi
            pl.BlockSpec((1, I, H), lyr),        # wf (bf16)
            pl.BlockSpec((1, 1, H), lyr),        # bf
            pl.BlockSpec((1, 1, H), lyr),        # ln2 gamma
            pl.BlockSpec((1, 1, H), lyr),        # ln2 beta
        ],
        out_specs=pl.BlockSpec((M, H), cst2),
        scratch_shapes=[pltpu.VMEM((M, H), jnp.float32)],      # carried hidden state
    )
    return pl.pallas_call(
        functools.partial(_encoder_layer_kernel, batch=B, seq=S,
                          num_heads=NUM_HEADS, head_dim=HEAD_DIM, eps=LN_EPS),
        out_shape=jax.ShapeDtypeStruct((M, H), _BF16),
        grid_spec=grid_spec,
        compiler_params=pltpu.CompilerParams(dimension_semantics=("arbitrary",)),
    )(mask3, h0,
      params["wqkv"], params["bqkv"], params["wo"], params["bo"],
      params["ln1_g"], params["ln1_b"],
      params["wi"], params["bi"], params["wf"], params["bf"],
      params["ln2_g"], params["ln2_b"])


# -----------------------------------------------------------------------------
# Kernel 3: pooler (tanh) + classifier, lane-dense padded output
# -----------------------------------------------------------------------------
def _pool_cls_kernel(cls_ref, pw_ref, pb_ref, cw_ref, cb_ref, o_ref):
    pooled = jnp.tanh(_mm(cls_ref[...], pw_ref[...]) + pb_ref[...])
    o_ref[...] = (_mm(pooled, cw_ref[...]) + cb_ref[...]).astype(o_ref.dtype)


def pool_classify(cls, pool_w, pool_b, cls_w_pad, cls_b_pad):
    """Fused pooler tanh(cls @ pool_w + pool_b) + classifier, 128-lane padded output."""
    B, H = cls.shape
    N = cls_w_pad.shape[1]
    return pl.pallas_call(
        _pool_cls_kernel,
        out_shape=jax.ShapeDtypeStruct((B, N), jnp.float32),
        grid=(1,),
        in_specs=[
            pl.BlockSpec((B, H), lambda i: (0, 0)),
            pl.BlockSpec((H, H), lambda i: (0, 0)),
            pl.BlockSpec((1, H), lambda i: (0, 0)),
            pl.BlockSpec((H, N), lambda i: (0, 0)),
            pl.BlockSpec((1, N), lambda i: (0, 0)),
        ],
        out_specs=pl.BlockSpec((B, N), lambda i: (0, 0)),
    )(cls, pool_w, pool_b.reshape(1, H), cls_w_pad, cls_b_pad.reshape(1, N))


# -----------------------------------------------------------------------------
# Parameters (stacked per-layer weights; matrices bf16, biases/LN f32)
# -----------------------------------------------------------------------------
def init_params(key):
    std = 0.02

    def dense(k, shape):
        return jax.random.normal(k, shape, jnp.float32) * std

    ki = iter(jax.random.split(key, 16))
    p = {
        "word_emb": dense(next(ki), (VOCAB, HIDDEN)),
        "pos_emb": dense(next(ki), (MAX_POS, HIDDEN)),
        "type_emb": dense(next(ki), (2, HIDDEN)),
        "emb_ln_g": jnp.ones((HIDDEN,), jnp.float32),
        "emb_ln_b": jnp.zeros((HIDDEN,), jnp.float32),
        "pool_w": dense(next(ki), (HIDDEN, HIDDEN)).astype(_BF16),
        "pool_b": jnp.zeros((HIDDEN,), jnp.float32),
    }
    cls_w = dense(next(ki), (HIDDEN, NUM_CLASSES))
    p["cls_w_pad"] = jnp.pad(cls_w, ((0, 0), (0, CLS_PAD - NUM_CLASSES))).astype(_BF16)
    p["cls_b_pad"] = jnp.zeros((CLS_PAD,), jnp.float32)

    L, H, I = NUM_LAYERS, HIDDEN, INTERMEDIATE
    p["wqkv"] = dense(next(ki), (L, H, 3 * H)).astype(_BF16)   # fused Q|K|V projection
    p["bqkv"] = jnp.zeros((L, 1, 3 * H), jnp.float32)
    p["wo"] = dense(next(ki), (L, H, H)).astype(_BF16)
    p["bo"] = jnp.zeros((L, 1, H), jnp.float32)
    p["ln1_g"] = jnp.ones((L, 1, H), jnp.float32)
    p["ln1_b"] = jnp.zeros((L, 1, H), jnp.float32)
    p["wi"] = dense(next(ki), (L, H, I)).astype(_BF16)
    p["bi"] = jnp.zeros((L, 1, I), jnp.float32)
    p["wf"] = dense(next(ki), (L, I, H)).astype(_BF16)
    p["bf"] = jnp.zeros((L, 1, H), jnp.float32)
    p["ln2_g"] = jnp.ones((L, 1, H), jnp.float32)
    p["ln2_b"] = jnp.zeros((L, 1, H), jnp.float32)
    return p


# -----------------------------------------------------------------------------
# Forward pass (equivalent of Bert.forward: logits of shape (B, NUM_CLASSES))
# -----------------------------------------------------------------------------
def bert_forward(params, input_ids, attention_mask):
    B, S = input_ids.shape

    # embeddings: gather is JAX glue; sum + LN fused in one Pallas kernel (grid over batch)
    word = jnp.take(params["word_emb"], input_ids.reshape(-1), axis=0)    # (B*S, H)
    pos = params["pos_emb"][:S]                                           # (S, H)
    tok = params["type_emb"][0]                                           # (H,) token_type_ids = 0
    h = embed_layernorm(word, pos, tok, params["emb_ln_g"], params["emb_ln_b"], B, S)

    # raw (B, 1, S) mask; the -10000 additive mask is built inside the encoder kernel
    mask3 = attention_mask.astype(jnp.float32).reshape(B, 1, S)

    # whole encoder stack: single pallas_call, grid over layers, h resident in VMEM
    h = encoder_stack(h, mask3, params, B, S)                             # (B*S, H) bf16

    # pooler + classifier (fused, 128-lane padded output); Dropout(p=0.2) is identity in eval
    cls = h.reshape(B, S, HIDDEN)[:, 0, :]                                # (B, H)
    logits_pad = pool_classify(cls, params["pool_w"], params["pool_b"],
                               params["cls_w_pad"], params["cls_b_pad"])  # (B, 128)
    return logits_pad[:, :NUM_CLASSES]


if __name__ == "__main__":
    B, S = 2, 8
    key = jax.random.PRNGKey(0)
    k_param, k_ids = jax.random.split(key)

    params = init_params(k_param)
    input_ids = jax.random.randint(k_ids, (B, S), 0, VOCAB, dtype=jnp.int32)
    # mask last two tokens of the second sequence
    attention_mask = jnp.array(
        [[1] * S, [1] * (S - 2) + [0, 0]], dtype=jnp.float32
    )

    fwd = jax.jit(bert_forward)
    logits = fwd(params, input_ids, attention_mask)
    jax.block_until_ready(logits)
    assert logits.shape == (B, NUM_CLASSES)
    assert bool(jnp.all(jnp.isfinite(logits)))
    print("KERNEL_OK")
</pallas_src>

<mosaic_0001>
module attributes {stable_mosaic.version = 11 : i64} {
  func.func @_embed_ln_kernel(%arg0: i32, %arg1: memref<8x128xf32, #tpu.memory_space<vmem>>, %arg2: memref<8x128xf32, #tpu.memory_space<vmem>>, %arg3: memref<1x128xf32, #tpu.memory_space<vmem>>, %arg4: memref<1x128xf32, #tpu.memory_space<vmem>>, %arg5: memref<1x128xf32, #tpu.memory_space<vmem>>, %arg6: memref<8x128xbf16, #tpu.memory_space<vmem>>) attributes {dimension_semantics = [#tpu.dimension_semantics<parallel>], iteration_bounds = array<i64: 2>, scalar_prefetch = 0 : i64, scratch_operands = 0 : i64, tpu.core_type = #tpu.core_type<tc>, window_params = [{transform_indices = @transform_0, window_bounds = array<i64: 8, 128>}, {pipeline_mode = #tpu.pipeline_mode<synchronous>, transform_indices = @transform_1, window_bounds = array<i64: 8, 128>}, {pipeline_mode = #tpu.pipeline_mode<synchronous>, transform_indices = @transform_2, window_bounds = array<i64: 1, 128>}, {pipeline_mode = #tpu.pipeline_mode<synchronous>, transform_indices = @transform_3, window_bounds = array<i64: 1, 128>}, {pipeline_mode = #tpu.pipeline_mode<synchronous>, transform_indices = @transform_4, window_bounds = array<i64: 1, 128>}, {transform_indices = @transform_5, window_bounds = array<i64: 8, 128>}]} {
    %c0 = arith.constant 0 : index
    %c0_0 = arith.constant 0 : index
    %0 = vector.load %arg1[%c0, %c0_0] : memref<8x128xf32, #tpu.memory_space<vmem>>, vector<8x128xf32>
    %c0_1 = arith.constant 0 : index
    %c0_2 = arith.constant 0 : index
    %1 = vector.load %arg2[%c0_1, %c0_2] : memref<8x128xf32, #tpu.memory_space<vmem>>, vector<8x128xf32>
    %2 = arith.addf %0, %1 : vector<8x128xf32>
    %c0_3 = arith.constant 0 : index
    %c0_4 = arith.constant 0 : index
    %3 = vector.load %arg3[%c0_3, %c0_4] : memref<1x128xf32, #tpu.memory_space<vmem>>, vector<1x128xf32>
    %4 = vector.broadcast %3 : vector<1x128xf32> to vector<8x128xf32>
    %5 = arith.addf %2, %4 : vector<8x128xf32>
    %c0_5 = arith.constant 0 : index
    %c0_6 = arith.constant 0 : index
    %6 = vector.load %arg4[%c0_5, %c0_6] : memref<1x128xf32, #tpu.memory_space<vmem>>, vector<1x128xf32>
    %c0_7 = arith.constant 0 : index
    %c0_8 = arith.constant 0 : index
    %7 = vector.load %arg5[%c0_7, %c0_8] : memref<1x128xf32, #tpu.memory_space<vmem>>, vector<1x128xf32>
    %cst = arith.constant dense<0.000000e+00> : vector<8xf32>
    %8 = vector.multi_reduction <add>, %5, %cst [1] : vector<8x128xf32> to vector<8xf32>
    %9 = vector.shape_cast %8 : vector<8xf32> to vector<8x1xf32>
    %cst_9 = arith.constant 1.280000e+02 : f32
    %10 = vector.broadcast %cst_9 : f32 to vector<8x1xf32>
    %11 = arith.divf %9, %10 : vector<8x1xf32>
    %12 = vector.broadcast %11 : vector<8x1xf32> to vector<8x128xf32>
    %13 = arith.subf %5, %12 : vector<8x128xf32>
    %14 = arith.mulf %13, %13 : vector<8x128xf32>
    %cst_10 = arith.constant dense<0.000000e+00> : vector<8xf32>
    %15 = vector.multi_reduction <add>, %14, %cst_10 [1] : vector<8x128xf32> to vector<8xf32>
    %16 = vector.shape_cast %15 : vector<8xf32> to vector<8x1xf32>
    %cst_11 = arith.constant 1.280000e+02 : f32
    %17 = vector.broadcast %cst_11 : f32 to vector<8x1xf32>
    %18 = arith.divf %16, %17 : vector<8x1xf32>
    %cst_12 = arith.constant 9.99999996E-13 : f32
    %19 = vector.broadcast %cst_12 : f32 to vector<8x1xf32>
    %20 = arith.addf %18, %19 : vector<8x1xf32>
    %21 = math.rsqrt %20 : vector<8x1xf32>
    %22 = vector.broadcast %21 : vector<8x1xf32> to vector<8x128xf32>
    %23 = arith.mulf %13, %22 : vector<8x128xf32>
    %24 = vector.broadcast %6 : vector<1x128xf32> to vector<8x128xf32>
    %25 = arith.mulf %23, %24 : vector<8x128xf32>
    %26 = vector.broadcast %7 : vector<1x128xf32> to vector<8x128xf32>
    %27 = arith.addf %25, %26 : vector<8x128xf32>
    %28 = arith.truncf %27 : vector<8x128xf32> to vector<8x128xbf16>
    %c0_13 = arith.constant 0 : index
    %c0_14 = arith.constant 0 : index
    %29 = vector.load %arg6[%c0_13, %c0_14] : memref<8x128xbf16, #tpu.memory_space<vmem>>, vector<8x128xbf16>
    tpu.vector_store %arg6[%c0_13, %c0_14], %28 {strides = array<i32>} : memref<8x128xbf16, #tpu.memory_space<vmem>>, vector<8x128xbf16>,
    return
  }
  func.func @transform_0(%arg0: i32) -> (i32, i32) {
    %c0_i32 = arith.constant 0 : i32
    %c0_i32_0 = arith.constant 0 : i32
    return %arg0, %c0_i32 : i32, i32
  }
  func.func @transform_1(%arg0: i32) -> (i32, i32) {
    %c0_i32 = arith.constant 0 : i32
    %c0_i32_0 = arith.constant 0 : i32
    %c0_i32_1 = arith.constant 0 : i32
    return %c0_i32, %c0_i32_0 : i32, i32
  }
  func.func @transform_2(%arg0: i32) -> (i32, i32) {
    %c0_i32 = arith.constant 0 : i32
    %c0_i32_0 = arith.constant 0 : i32
    %c0_i32_1 = arith.constant 0 : i32
    return %c0_i32, %c0_i32_0 : i32, i32
  }
  func.func @transform_3(%arg0: i32) -> (i32, i32) {
    %c0_i32 = arith.constant 0 : i32
    %c0_i32_0 = arith.constant 0 : i32
    %c0_i32_1 = arith.constant 0 : i32
    return %c0_i32, %c0_i32_0 : i32, i32
  }
  func.func @transform_4(%arg0: i32) -> (i32, i32) {
    %c0_i32 = arith.constant 0 : i32
    %c0_i32_0 = arith.constant 0 : i32
    %c0_i32_1 = arith.constant 0 : i32
    return %c0_i32, %c0_i32_0 : i32, i32
  }
  func.func @transform_5(%arg0: i32) -> (i32, i32) {
    %c0_i32 = arith.constant 0 : i32
    %c0_i32_0 = arith.constant 0 : i32
    return %arg0, %c0_i32 : i32, i32
  }
}

module attributes {stable_mosaic.version = 11 : i64} {
  func.func @_encoder_layer_kernel(%arg0: i32, %arg1: memref<2x1x8xf32, #tpu.memory_space<vmem>>, %arg2: memref<16x128xbf16, #tpu.memory_space<vmem>>, %arg3: memref<1x128x384xbf16, #tpu.memory_space<vmem>>, %arg4: memref<1x1x384xf32, #tpu.memory_space<vmem>>, %arg5: memref<1x128x128xbf16, #tpu.memory_space<vmem>>, %arg6: memref<1x1x128xf32, #tpu.memory_space<vmem>>, %arg7: memref<1x1x128xf32, #tpu.memory_space<vmem>>, %arg8: memref<1x1x128xf32, #tpu.memory_space<vmem>>, %arg9: memref<1x128x256xbf16, #tpu.memory_space<vmem>>, %arg10: memref<1x1x256xf32, #tpu.memory_space<vmem>>, %arg11: memref<1x256x128xbf16, #tpu.memory_space<vmem>>, %arg12: memref<1x1x128xf32, #tpu.memory_space<vmem>>, %arg13: memref<1x1x128xf32, #tpu.memory_space<vmem>>, %arg14: memref<1x1x128xf32, #tpu.memory_space<vmem>>, %arg15: memref<16x128xbf16, #tpu.memory_space<vmem>>, %arg16: memref<16x128xf32, #tpu.memory_space<vmem>>) attributes {dimension_semantics = [#tpu.dimension_semantics<arbitrary>], iteration_bounds = array<i64: 2>, scalar_prefetch = 0 : i64, scratch_operands = 1 : i64, tpu.core_type = #tpu.core_type<tc>, window_params = [{pipeline_mode = #tpu.pipeline_mode<synchronous>, transform_indices = @transform_0, window_bounds = array<i64: 2, 1, 8>}, {pipeline_mode = #tpu.pipeline_mode<synchronous>, transform_indices = @transform_1, window_bounds = array<i64: 16, 128>}, {transform_indices = @transform_2, window_bounds = array<i64: 1, 128, 384>}, {transform_indices = @transform_3, window_bounds = array<i64: 1, 1, 384>}, {transform_indices = @transform_4, window_bounds = array<i64: 1, 128, 128>}, {transform_indices = @transform_5, window_bounds = array<i64: 1, 1, 128>}, {transform_indices = @transform_6, window_bounds = array<i64: 1, 1, 128>}, {transform_indices = @transform_7, window_bounds = array<i64: 1, 1, 128>}, {transform_indices = @transform_8, window_bounds = array<i64: 1, 128, 256>}, {transform_indices = @transform_9, window_bounds = array<i64: 1, 1, 256>}, {transform_indices = @transform_10, window_bounds = array<i64: 1, 256, 128>}, {transform_indices = @transform_11, window_bounds = array<i64: 1, 1, 128>}, {transform_indices = @transform_12, window_bounds = array<i64: 1, 1, 128>}, {transform_indices = @transform_13, window_bounds = array<i64: 1, 1, 128>}, {pipeline_mode = #tpu.pipeline_mode<synchronous>, transform_indices = @transform_14, window_bounds = array<i64: 16, 128>}]} {
    %c0_i32 = arith.constant 0 : i32
    %0 = arith.cmpi eq, %arg0, %c0_i32 : i32
    %1 = arith.extui %0 : i1 to i32
    %c0_i32_0 = arith.constant 0 : i32
    %2 = arith.cmpi ne, %1, %c0_i32_0 : i32
    scf.if %2 {
      %c0_88 = arith.constant 0 : index
      %c0_89 = arith.constant 0 : index
      %201 = vector.load %arg2[%c0_88, %c0_89] : memref<16x128xbf16, #tpu.memory_space<vmem>>, vector<16x128xbf16>
      %202 = arith.extf %201 : vector<16x128xbf16> to vector<16x128xf32>
      %c0_90 = arith.constant 0 : index
      %c0_91 = arith.constant 0 : index
      %203 = vector.load %arg16[%c0_90, %c0_91] : memref<16x128xf32, #tpu.memory_space<vmem>>, vector<16x128xf32>
      tpu.vector_store %arg16[%c0_90, %c0_91], %202 {strides = array<i32>} : memref<16x128xf32, #tpu.memory_space<vmem>>, vector<16x128xf32>,
    } else {
    }
    %c0 = arith.constant 0 : index
    %c0_1 = arith.constant 0 : index
    %3 = vector.load %arg16[%c0, %c0_1] : memref<16x128xf32, #tpu.memory_space<vmem>>, vector<16x128xf32>
    %4 = arith.truncf %3 : vector<16x128xf32> to vector<16x128xbf16>
    %c0_2 = arith.constant 0 : index
    %c0_3 = arith.constant 0 : index
    %c0_4 = arith.constant 0 : index
    %5 = vector.load %arg3[%c0_2, %c0_3, %c0_4] : memref<1x128x384xbf16, #tpu.memory_space<vmem>>, vector<1x128x384xbf16>
    %6 = vector.shape_cast %5 : vector<1x128x384xbf16> to vector<128x384xbf16>
    %cst = arith.constant dense<0.000000e+00> : vector<16x384xf32>
    %7 = tpu.matmul %4, %6, %cst {dimension_numbers = #tpu.dot_dimension_numbers<[1], [0], [0], [1], [0, 0, 1, 1], [], []>} : vector<16x128xbf16>, vector<128x384xbf16>, vector<16x384xf32> -> vector<16x384xf32>
    %c0_5 = arith.constant 0 : index
    %c0_6 = arith.constant 0 : index
    %c0_7 = arith.constant 0 : index
    %8 = vector.load %arg4[%c0_5, %c0_6, %c0_7] : memref<1x1x384xf32, #tpu.memory_space<vmem>>, vector<1x1x384xf32>
    %9 = vector.shape_cast %8 : vector<1x1x384xf32> to vector<1x384xf32>
    %10 = vector.broadcast %9 : vector<1x384xf32> to vector<16x384xf32>
    %11 = arith.addf %7, %10 : vector<16x384xf32>
    %12 = vector.extract_strided_slice %11 {offsets = [0, 0], sizes = [8, 384], strides = [1, 1]} : vector<16x384xf32> to vector<8x384xf32>
    %13 = arith.truncf %12 : vector<8x384xf32> to vector<8x384xbf16>
    %c0_8 = arith.constant 0 : index
    %c0_9 = arith.constant 0 : index
    %c0_10 = arith.constant 0 : index
    %14 = vector.load %arg1[%c0_8, %c0_9, %c0_10] : memref<2x1x8xf32, #tpu.memory_space<vmem>>, vector<1x1x8xf32>
    %15 = vector.shape_cast %14 : vector<1x1x8xf32> to vector<1x8xf32>
    %cst_11 = arith.constant 1.000000e+00 : f32
    %16 = vector.broadcast %cst_11 : f32 to vector<1x8xf32>
    %17 = arith.subf %16, %15 : vector<1x8xf32>
    %cst_12 = arith.constant -1.000000e+04 : f32
    %18 = vector.broadcast %cst_12 : f32 to vector<1x8xf32>
    %19 = arith.mulf %17, %18 : vector<1x8xf32>
    %20 = vector.extract_strided_slice %13 {offsets = [0, 0], sizes = [8, 64], strides = [1, 1]} : vector<8x384xbf16> to vector<8x64xbf16>
    %21 = vector.extract_strided_slice %13 {offsets = [0, 128], sizes = [8, 64], strides = [1, 1]} : vector<8x384xbf16> to vector<8x64xbf16>
    %22 = vector.extract_strided_slice %13 {offsets = [0, 256], sizes = [8, 64], strides = [1, 1]} : vector<8x384xbf16> to vector<8x64xbf16>
    %cst_13 = arith.constant dense<0.000000e+00> : vector<8x8xf32>
    %23 = tpu.matmul %20, %21, %cst_13 {dimension_numbers = #tpu.dot_dimension_numbers<[1], [1], [0], [0], [0, 0, 1, 0], [], []>} : vector<8x64xbf16>, vector<8x64xbf16>, vector<8x8xf32> -> vector<8x8xf32>
    %cst_14 = arith.constant 1.250000e-01 : f32
    %24 = vector.broadcast %cst_14 : f32 to vector<8x8xf32>
    %25 = arith.mulf %23, %24 : vector<8x8xf32>
    %26 = vector.broadcast %19 : vector<1x8xf32> to vector<8x8xf32>
    %27 = arith.addf %25, %26 : vector<8x8xf32>
    %cst_15 = arith.constant dense<0xFF800000> : vector<8xf32>
    %28 = vector.multi_reduction <maximumf>, %27, %cst_15 [1] : vector<8x8xf32> to vector<8xf32>
    %29 = vector.shape_cast %28 : vector<8xf32> to vector<8x1xf32>
    %30 = vector.broadcast %29 : vector<8x1xf32> to vector<8x8xf32>
    %31 = arith.subf %27, %30 : vector<8x8xf32>
    %32 = math.exp %31 : vector<8x8xf32>
    %cst_16 = arith.constant dense<0.000000e+00> : vector<8xf32>
    %33 = vector.multi_reduction <add>, %32, %cst_16 [1] : vector<8x8xf32> to vector<8xf32>
    %34 = vector.shape_cast %33 : vector<8xf32> to vector<8x1xf32>
    %35 = tpu.reciprocal %34 {approx = true} : vector<8x1xf32> -> vector<8x1xf32>
    %36 = vector.broadcast %35 : vector<8x1xf32> to vector<8x8xf32>
    %37 = arith.mulf %32, %36 : vector<8x8xf32>
    %38 = arith.truncf %37 : vector<8x8xf32> to vector<8x8xbf16>
    %cst_17 = arith.constant dense<0.000000e+00> : vector<8x64xf32>
    %39 = tpu.matmul %38, %22, %cst_17 {dimension_numbers = #tpu.dot_dimension_numbers<[1], [0], [0], [1], [0, 0, 1, 1], [], []>} : vector<8x8xbf16>, vector<8x64xbf16>, vector<8x64xf32> -> vector<8x64xf32>
    %40 = vector.extract_strided_slice %13 {offsets = [0, 64], sizes = [8, 64], strides = [1, 1]} : vector<8x384xbf16> to vector<8x64xbf16>
    %41 = vector.extract_strided_slice %13 {offsets = [0, 192], sizes = [8, 64], strides = [1, 1]} : vector<8x384xbf16> to vector<8x64xbf16>
    %42 = vector.extract_strided_slice %13 {offsets = [0, 320], sizes = [8, 64], strides = [1, 1]} : vector<8x384xbf16> to vector<8x64xbf16>
    %cst_18 = arith.constant dense<0.000000e+00> : vector<8x8xf32>
    %43 = tpu.matmul %40, %41, %cst_18 {dimension_numbers = #tpu.dot_dimension_numbers<[1], [1], [0], [0], [0, 0, 1, 0], [], []>} : vector<8x64xbf16>, vector<8x64xbf16>, vector<8x8xf32> -> vector<8x8xf32>
    %cst_19 = arith.constant 1.250000e-01 : f32
    %44 = vector.broadcast %cst_19 : f32 to vector<8x8xf32>
    %45 = arith.mulf %43, %44 : vector<8x8xf32>
    %46 = vector.broadcast %19 : vector<1x8xf32> to vector<8x8xf32>
    %47 = arith.addf %45, %46 : vector<8x8xf32>
    %cst_20 = arith.constant dense<0xFF800000> : vector<8xf32>
    %48 = vector.multi_reduction <maximumf>, %47, %cst_20 [1] : vector<8x8xf32> to vector<8xf32>
    %49 = vector.shape_cast %48 : vector<8xf32> to vector<8x1xf32>
    %50 = vector.broadcast %49 : vector<8x1xf32> to vector<8x8xf32>
    %51 = arith.subf %47, %50 : vector<8x8xf32>
    %52 = math.exp %51 : vector<8x8xf32>
    %cst_21 = arith.constant dense<0.000000e+00> : vector<8xf32>
    %53 = vector.multi_reduction <add>, %52, %cst_21 [1] : vector<8x8xf32> to vector<8xf32>
    %54 = vector.shape_cast %53 : vector<8xf32> to vector<8x1xf32>
    %55 = tpu.reciprocal %54 {approx = true} : vector<8x1xf32> -> vector<8x1xf32>
    %56 = vector.broadcast %55 : vector<8x1xf32> to vector<8x8xf32>
    %57 = arith.mulf %52, %56 : vector<8x8xf32>
    %58 = arith.truncf %57 : vector<8x8xf32> to vector<8x8xbf16>
    %cst_22 = arith.constant dense<0.000000e+00> : vector<8x64xf32>
    %59 = tpu.matmul %58, %42, %cst_22 {dimension_numbers = #tpu.dot_dimension_numbers<[1], [0], [0], [1], [0, 0, 1, 1], [], []>} : vector<8x8xbf16>, vector<8x64xbf16>, vector<8x64xf32> -> vector<8x64xf32>
    %60 = tpu.concatenate %39, %59 in 1 : vector<8x64xf32>, vector<8x64xf32> -> vector<8x128xf32>
    %61 = vector.extract_strided_slice %11 {offsets = [8, 0], sizes = [8, 384], strides = [1, 1]} : vector<16x384xf32> to vector<8x384xf32>
    %62 = arith.truncf %61 : vector<8x384xf32> to vector<8x384xbf16>
    %c1 = arith.constant 1 : index
    %c0_23 = arith.constant 0 : index
    %c0_24 = arith.constant 0 : index
    %63 = vector.load %arg1[%c1, %c0_23, %c0_24] : memref<2x1x8xf32, #tpu.memory_space<vmem>>, vector<1x1x8xf32>
    %64 = vector.shape_cast %63 : vector<1x1x8xf32> to vector<1x8xf32>
    %cst_25 = arith.constant 1.000000e+00 : f32
    %65 = vector.broadcast %cst_25 : f32 to vector<1x8xf32>
    %66 = arith.subf %65, %64 : vector<1x8xf32>
    %cst_26 = arith.constant -1.000000e+04 : f32
    %67 = vector.broadcast %cst_26 : f32 to vector<1x8xf32>
    %68 = arith.mulf %66, %67 : vector<1x8xf32>
    %69 = vector.extract_strided_slice %62 {offsets = [0, 0], sizes = [8, 64], strides = [1, 1]} : vector<8x384xbf16> to vector<8x64xbf16>
    %70 = vector.extract_strided_slice %62 {offsets = [0, 128], sizes = [8, 64], strides = [1, 1]} : vector<8x384xbf16> to vector<8x64xbf16>
    %71 = vector.extract_strided_slice %62 {offsets = [0, 256], sizes = [8, 64], strides = [1, 1]} : vector<8x384xbf16> to vector<8x64xbf16>
    %cst_27 = arith.constant dense<0.000000e+00> : vector<8x8xf32>
    %72 = tpu.matmul %69, %70, %cst_27 {dimension_numbers = #tpu.dot_dimension_numbers<[1], [1], [0], [0], [0, 0, 1, 0], [], []>} : vector<8x64xbf16>, vector<8x64xbf16>, vector<8x8xf32> -> vector<8x8xf32>
    %cst_28 = arith.constant 1.250000e-01 : f32
    %73 = vector.broadcast %cst_28 : f32 to vector<8x8xf32>
    %74 = arith.mulf %72, %73 : vector<8x8xf32>
    %75 = vector.broadcast %68 : vector<1x8xf32> to vector<8x8xf32>
    %76 = arith.addf %74, %75 : vector<8x8xf32>
    %cst_29 = arith.constant dense<0xFF800000> : vector<8xf32>
    %77 = vector.multi_reduction <maximumf>, %76, %cst_29 [1] : vector<8x8xf32> to vector<8xf32>
    %78 = vector.shape_cast %77 : vector<8xf32> to vector<8x1xf32>
    %79 = vector.broadcast %78 : vector<8x1xf32> to vector<8x8xf32>
    %80 = arith.subf %76, %79 : vector<8x8xf32>
    %81 = math.exp %80 : vector<8x8xf32>
    %cst_30 = arith.constant dense<0.000000e+00> : vector<8xf32>
    %82 = vector.multi_reduction <add>, %81, %cst_30 [1] : vector<8x8xf32> to vector<8xf32>
    %83 = vector.shape_cast %82 : vector<8xf32> to vector<8x1xf32>
    %84 = tpu.reciprocal %83 {approx = true} : vector<8x1xf32> -> vector<8x1xf32>
    %85 = vector.broadcast %84 : vector<8x1xf32> to vector<8x8xf32>
    %86 = arith.mulf %81, %85 : vector<8x8xf32>
    %87 = arith.truncf %86 : vector<8x8xf32> to vector<8x8xbf16>
    %cst_31 = arith.constant dense<0.000000e+00> : vector<8x64xf32>
    %88 = tpu.matmul %87, %71, %cst_31 {dimension_numbers = #tpu.dot_dimension_numbers<[1], [0], [0], [1], [0, 0, 1, 1], [], []>} : vector<8x8xbf16>, vector<8x64xbf16>, vector<8x64xf32> -> vector<8x64xf32>
    %89 = vector.extract_strided_slice %62 {offsets = [0, 64], sizes = [8, 64], strides = [1, 1]} : vector<8x384xbf16> to vector<8x64xbf16>
    %90 = vector.extract_strided_slice %62 {offsets = [0, 192], sizes = [8, 64], strides = [1, 1]} : vector<8x384xbf16> to vector<8x64xbf16>
    %91 = vector.extract_strided_slice %62 {offsets = [0, 320], sizes = [8, 64], strides = [1, 1]} : vector<8x384xbf16> to vector<8x64xbf16>
    %cst_32 = arith.constant dense<0.000000e+00> : vector<8x8xf32>
    %92 = tpu.matmul %89, %90, %cst_32 {dimension_numbers = #tpu.dot_dimension_numbers<[1], [1], [0], [0], [0, 0, 1, 0], [], []>} : vector<8x64xbf16>, vector<8x64xbf16>, vector<8x8xf32> -> vector<8x8xf32>
    %cst_33 = arith.constant 1.250000e-01 : f32
    %93 = vector.broadcast %cst_33 : f32 to vector<8x8xf32>
    %94 = arith.mulf %92, %93 : vector<8x8xf32>
    %95 = vector.broadcast %68 : vector<1x8xf32> to vector<8x8xf32>
    %96 = arith.addf %94, %95 : vector<8x8xf32>
    %cst_34 = arith.constant dense<0xFF800000> : vector<8xf32>
    %97 = vector.multi_reduction <maximumf>, %96, %cst_34 [1] : vector<8x8xf32> to vector<8xf32>
    %98 = vector.shape_cast %97 : vector<8xf32> to vector<8x1xf32>
    %99 = vector.broadcast %98 : vector<8x1xf32> to vector<8x8xf32>
    %100 = arith.subf %96, %99 : vector<8x8xf32>
    %101 = math.exp %100 : vector<8x8xf32>
    %cst_35 = arith.constant dense<0.000000e+00> : vector<8xf32>
    %102 = vector.multi_reduction <add>, %101, %cst_35 [1] : vector<8x8xf32> to vector<8xf32>
    %103 = vector.shape_cast %102 : vector<8xf32> to vector<8x1xf32>
    %104 = tpu.reciprocal %103 {approx = true} : vector<8x1xf32> -> vector<8x1xf32>
    %105 = vector.broadcast %104 : vector<8x1xf32> to vector<8x8xf32>
    %106 = arith.mulf %101, %105 : vector<8x8xf32>
    %107 = arith.truncf %106 : vector<8x8xf32> to vector<8x8xbf16>
    %cst_36 = arith.constant dense<0.000000e+00> : vector<8x64xf32>
    %108 = tpu.matmul %107, %91, %cst_36 {dimension_numbers = #tpu.dot_dimension_numbers<[1], [0], [0], [1], [0, 0, 1, 1], [], []>} : vector<8x8xbf16>, vector<8x64xbf16>, vector<8x64xf32> -> vector<8x64xf32>
    %109 = tpu.concatenate %88, %108 in 1 : vector<8x64xf32>, vector<8x64xf32> -> vector<8x128xf32>
    %110 = tpu.concatenate %60, %109 in 0 : vector<8x128xf32>, vector<8x128xf32> -> vector<16x128xf32>
    %c0_37 = arith.constant 0 : index
    %c0_38 = arith.constant 0 : index
    %c0_39 = arith.constant 0 : index
    %111 = vector.load %arg5[%c0_37, %c0_38, %c0_39] : memref<1x128x128xbf16, #tpu.memory_space<vmem>>, vector<1x128x128xbf16>
    %112 = vector.shape_cast %111 : vector<1x128x128xbf16> to vector<128x128xbf16>
    %113 = arith.truncf %110 : vector<16x128xf32> to vector<16x128xbf16>
    %cst_40 = arith.constant dense<0.000000e+00> : vector<16x128xf32>
    %114 = tpu.matmul %113, %112, %cst_40 {dimension_numbers = #tpu.dot_dimension_numbers<[1], [0], [0], [1], [0, 0, 1, 1], [], []>} : vector<16x128xbf16>, vector<128x128xbf16>, vector<16x128xf32> -> vector<16x128xf32>
    %c0_41 = arith.constant 0 : index
    %c0_42 = arith.constant 0 : index
    %c0_43 = arith.constant 0 : index
    %115 = vector.load %arg6[%c0_41, %c0_42, %c0_43] : memref<1x1x128xf32, #tpu.memory_space<vmem>>, vector<1x1x128xf32>
    %116 = vector.shape_cast %115 : vector<1x1x128xf32> to vector<1x128xf32>
    %117 = vector.broadcast %116 : vector<1x128xf32> to vector<16x128xf32>
    %118 = arith.addf %114, %117 : vector<16x128xf32>
    %119 = arith.addf %3, %118 : vector<16x128xf32>
    %c0_44 = arith.constant 0 : index
    %c0_45 = arith.constant 0 : index
    %c0_46 = arith.constant 0 : index
    %120 = vector.load %arg7[%c0_44, %c0_45, %c0_46] : memref<1x1x128xf32, #tpu.memory_space<vmem>>, vector<1x1x128xf32>
    %121 = vector.shape_cast %120 : vector<1x1x128xf32> to vector<1x128xf32>
    %c0_47 = arith.constant 0 : index
    %c0_48 = arith.constant 0 : index
    %c0_49 = arith.constant 0 : index
    %122 = vector.load %arg8[%c0_47, %c0_48, %c0_49] : memref<1x1x128xf32, #tpu.memory_space<vmem>>, vector<1x1x128xf32>
    %123 = vector.shape_cast %122 : vector<1x1x128xf32> to vector<1x128xf32>
    %cst_50 = arith.constant dense<0.000000e+00> : vector<16xf32>
    %124 = vector.multi_reduction <add>, %119, %cst_50 [1] : vector<16x128xf32> to vector<16xf32>
    %125 = vector.shape_cast %124 : vector<16xf32> to vector<16x1xf32>
    %cst_51 = arith.constant 1.280000e+02 : f32
    %126 = vector.broadcast %cst_51 : f32 to vector<16x1xf32>
    %127 = arith.divf %125, %126 : vector<16x1xf32>
    %128 = vector.broadcast %127 : vector<16x1xf32> to vector<16x128xf32>
    %129 = arith.subf %119, %128 : vector<16x128xf32>
    %130 = arith.mulf %129, %129 : vector<16x128xf32>
    %cst_52 = arith.constant dense<0.000000e+00> : vector<16xf32>
    %131 = vector.multi_reduction <add>, %130, %cst_52 [1] : vector<16x128xf32> to vector<16xf32>
    %132 = vector.shape_cast %131 : vector<16xf32> to vector<16x1xf32>
    %cst_53 = arith.constant 1.280000e+02 : f32
    %133 = vector.broadcast %cst_53 : f32 to vector<16x1xf32>
    %134 = arith.divf %132, %133 : vector<16x1xf32>
    %cst_54 = arith.constant 9.99999996E-13 : f32
    %135 = vector.broadcast %cst_54 : f32 to vector<16x1xf32>
    %136 = arith.addf %134, %135 : vector<16x1xf32>
    %137 = math.rsqrt %136 : vector<16x1xf32>
    %138 = vector.broadcast %137 : vector<16x1xf32> to vector<16x128xf32>
    %139 = arith.mulf %129, %138 : vector<16x128xf32>
    %140 = vector.broadcast %121 : vector<1x128xf32> to vector<16x128xf32>
    %141 = arith.mulf %139, %140 : vector<16x128xf32>
    %142 = vector.broadcast %123 : vector<1x128xf32> to vector<16x128xf32>
    %143 = arith.addf %141, %142 : vector<16x128xf32>
    %c0_55 = arith.constant 0 : index
    %c0_56 = arith.constant 0 : index
    %c0_57 = arith.constant 0 : index
    %144 = vector.load %arg9[%c0_55, %c0_56, %c0_57] : memref<1x128x256xbf16, #tpu.memory_space<vmem>>, vector<1x128x256xbf16>
    %145 = vector.shape_cast %144 : vector<1x128x256xbf16> to vector<128x256xbf16>
    %146 = arith.truncf %143 : vector<16x128xf32> to vector<16x128xbf16>
    %cst_58 = arith.constant dense<0.000000e+00> : vector<16x256xf32>
    %147 = tpu.matmul %146, %145, %cst_58 {dimension_numbers = #tpu.dot_dimension_numbers<[1], [0], [0], [1], [0, 0, 1, 1], [], []>} : vector<16x128xbf16>, vector<128x256xbf16>, vector<16x256xf32> -> vector<16x256xf32>
    %c0_59 = arith.constant 0 : index
    %c0_60 = arith.constant 0 : index
    %c0_61 = arith.constant 0 : index
    %148 = vector.load %arg10[%c0_59, %c0_60, %c0_61] : memref<1x1x256xf32, #tpu.memory_space<vmem>>, vector<1x1x256xf32>
    %149 = vector.shape_cast %148 : vector<1x1x256xf32> to vector<1x256xf32>
    %150 = vector.broadcast %149 : vector<1x256xf32> to vector<16x256xf32>
    %151 = arith.addf %147, %150 : vector<16x256xf32>
    %cst_62 = arith.constant 5.000000e-01 : f32
    %152 = vector.broadcast %cst_62 : f32 to vector<16x256xf32>
    %153 = arith.mulf %152, %151 : vector<16x256xf32>
    %cst_63 = arith.constant 4.471500e-02 : f32
    %154 = vector.broadcast %cst_63 : f32 to vector<16x256xf32>
    %155 = arith.mulf %154, %151 : vector<16x256xf32>
    %156 = arith.mulf %155, %151 : vector<16x256xf32>
    %157 = arith.mulf %156, %151 : vector<16x256xf32>
    %158 = arith.addf %151, %157 : vector<16x256xf32>
    %cst_64 = arith.constant 0.797884583 : f32
    %159 = vector.broadcast %cst_64 : f32 to vector<16x256xf32>
    %160 = arith.mulf %159, %158 : vector<16x256xf32>
    %161 = math.tanh %160 : vector<16x256xf32>
    %cst_65 = arith.constant 1.000000e+00 : f32
    %162 = vector.broadcast %cst_65 : f32 to vector<16x256xf32>
    %163 = arith.addf %162, %161 : vector<16x256xf32>
    %164 = arith.mulf %153, %163 : vector<16x256xf32>
    %c0_66 = arith.constant 0 : index
    %c0_67 = arith.constant 0 : index
    %c0_68 = arith.constant 0 : index
    %165 = vector.load %arg11[%c0_66, %c0_67, %c0_68] : memref<1x256x128xbf16, #tpu.memory_space<vmem>>, vector<1x256x128xbf16>
    %166 = vector.shape_cast %165 : vector<1x256x128xbf16> to vector<256x128xbf16>
    %167 = arith.truncf %164 : vector<16x256xf32> to vector<16x256xbf16>
    %cst_69 = arith.constant dense<0.000000e+00> : vector<16x128xf32>
    %168 = tpu.matmul %167, %166, %cst_69 {dimension_numbers = #tpu.dot_dimension_numbers<[1], [0], [0], [1], [0, 0, 1, 1], [], []>} : vector<16x256xbf16>, vector<256x128xbf16>, vector<16x128xf32> -> vector<16x128xf32>
    %c0_70 = arith.constant 0 : index
    %c0_71 = arith.constant 0 : index
    %c0_72 = arith.constant 0 : index
    %169 = vector.load %arg12[%c0_70, %c0_71, %c0_72] : memref<1x1x128xf32, #tpu.memory_space<vmem>>, vector<1x1x128xf32>
    %170 = vector.shape_cast %169 : vector<1x1x128xf32> to vector<1x128xf32>
    %171 = vector.broadcast %170 : vector<1x128xf32> to vector<16x128xf32>
    %172 = arith.addf %168, %171 : vector<16x128xf32>
    %173 = arith.addf %143, %172 : vector<16x128xf32>
    %c0_73 = arith.constant 0 : index
    %c0_74 = arith.constant 0 : index
    %c0_75 = arith.constant 0 : index
    %174 = vector.load %arg13[%c0_73, %c0_74, %c0_75] : memref<1x1x128xf32, #tpu.memory_space<vmem>>, vector<1x1x128xf32>
    %175 = vector.shape_cast %174 : vector<1x1x128xf32> to vector<1x128xf32>
    %c0_76 = arith.constant 0 : index
    %c0_77 = arith.constant 0 : index
    %c0_78 = arith.constant 0 : index
    %176 = vector.load %arg14[%c0_76, %c0_77, %c0_78] : memref<1x1x128xf32, #tpu.memory_space<vmem>>, vector<1x1x128xf32>
    %177 = vector.shape_cast %176 : vector<1x1x128xf32> to vector<1x128xf32>
    %cst_79 = arith.constant dense<0.000000e+00> : vector<16xf32>
    %178 = vector.multi_reduction <add>, %173, %cst_79 [1] : vector<16x128xf32> to vector<16xf32>
    %179 = vector.shape_cast %178 : vector<16xf32> to vector<16x1xf32>
    %cst_80 = arith.constant 1.280000e+02 : f32
    %180 = vector.broadcast %cst_80 : f32 to vector<16x1xf32>
    %181 = arith.divf %179, %180 : vector<16x1xf32>
    %182 = vector.broadcast %181 : vector<16x1xf32> to vector<16x128xf32>
    %183 = arith.subf %173, %182 : vector<16x128xf32>
    %184 = arith.mulf %183, %183 : vector<16x128xf32>
    %cst_81 = arith.constant dense<0.000000e+00> : vector<16xf32>
    %185 = vector.multi_reduction <add>, %184, %cst_81 [1] : vector<16x128xf32> to vector<16xf32>
    %186 = vector.shape_cast %185 : vector<16xf32> to vector<16x1xf32>
    %cst_82 = arith.constant 1.280000e+02 : f32
    %187 = vector.broadcast %cst_82 : f32 to vector<16x1xf32>
    %188 = arith.divf %186, %187 : vector<16x1xf32>
    %cst_83 = arith.constant 9.99999996E-13 : f32
    %189 = vector.broadcast %cst_83 : f32 to vector<16x1xf32>
    %190 = arith.addf %188, %189 : vector<16x1xf32>
    %191 = math.rsqrt %190 : vector<16x1xf32>
    %192 = vector.broadcast %191 : vector<16x1xf32> to vector<16x128xf32>
    %193 = arith.mulf %183, %192 : vector<16x128xf32>
    %194 = vector.broadcast %175 : vector<1x128xf32> to vector<16x128xf32>
    %195 = arith.mulf %193, %194 : vector<16x128xf32>
    %196 = vector.broadcast %177 : vector<1x128xf32> to vector<16x128xf32>
    %197 = arith.addf %195, %196 : vector<16x128xf32>
    %c0_84 = arith.constant 0 : index
    %c0_85 = arith.constant 0 : index
    %198 = vector.load %arg16[%c0_84, %c0_85] : memref<16x128xf32, #tpu.memory_space<vmem>>, vector<16x128xf32>
    tpu.vector_store %arg16[%c0_84, %c0_85], %197 {strides = array<i32>} : memref<16x128xf32, #tpu.memory_space<vmem>>, vector<16x128xf32>,
    %199 = arith.truncf %197 : vector<16x128xf32> to vector<16x128xbf16>
    %c0_86 = arith.constant 0 : index
    %c0_87 = arith.constant 0 : index
    %200 = vector.load %arg15[%c0_86, %c0_87] : memref<16x128xbf16, #tpu.memory_space<vmem>>, vector<16x128xbf16>
    tpu.vector_store %arg15[%c0_86, %c0_87], %199 {strides = array<i32>} : memref<16x128xbf16, #tpu.memory_space<vmem>>, vector<16x128xbf16>,
    return
  }
  func.func @transform_0(%arg0: i32) -> (i32, i32, i32) {
    %c0_i32 = arith.constant 0 : i32
    %c0_i32_0 = arith.constant 0 : i32
    %c0_i32_1 = arith.constant 0 : i32
    %c0_i32_2 = arith.constant 0 : i32
    return %c0_i32, %c0_i32_0, %c0_i32_1 : i32, i32, i32
  }
  func.func @transform_1(%arg0: i32) -> (i32, i32) {
    %c0_i32 = arith.constant 0 : i32
    %c0_i32_0 = arith.constant 0 : i32
    %c0_i32_1 = arith.constant 0 : i32
    return %c0_i32, %c0_i32_0 : i32, i32
  }
  func.func @transform_2(%arg0: i32) -> (i32, i32, i32) {
    %c0_i32 = arith.constant 0 : i32
    %c0_i32_0 = arith.constant 0 : i32
    %c0_i32_1 = arith.constant 0 : i32
    return %arg0, %c0_i32, %c0_i32_0 : i32, i32, i32
  }
  func.func @transform_3(%arg0: i32) -> (i32, i32, i32) {
    %c0_i32 = arith.constant 0 : i32
    %c0_i32_0 = arith.constant 0 : i32
    %c0_i32_1 = arith.constant 0 : i32
    return %arg0, %c0_i32, %c0_i32_0 : i32, i32, i32
  }
  func.func @transform_4(%arg0: i32) -> (i32, i32, i32) {
    %c0_i32 = arith.constant 0 : i32
    %c0_i32_0 = arith.constant 0 : i32
    %c0_i32_1 = arith.constant 0 : i32
    return %arg0, %c0_i32, %c0_i32_0 : i32, i32, i32
  }
  func.func @transform_5(%arg0: i32) -> (i32, i32, i32) {
    %c0_i32 = arith.constant 0 : i32
    %c0_i32_0 = arith.constant 0 : i32
    %c0_i32_1 = arith.constant 0 : i32
    return %arg0, %c0_i32, %c0_i32_0 : i32, i32, i32
  }
  func.func @transform_6(%arg0: i32) -> (i32, i32, i32) {
    %c0_i32 = arith.constant 0 : i32
    %c0_i32_0 = arith.constant 0 : i32
    %c0_i32_1 = arith.constant 0 : i32
    return %arg0, %c0_i32, %c0_i32_0 : i32, i32, i32
  }
  func.func @transform_7(%arg0: i32) -> (i32, i32, i32) {
    %c0_i32 = arith.constant 0 : i32
    %c0_i32_0 = arith.constant 0 : i32
    %c0_i32_1 = arith.constant 0 : i32
    return %arg0, %c0_i32, %c0_i32_0 : i32, i32, i32
  }
  func.func @transform_8(%arg0: i32) -> (i32, i32, i32) {
    %c0_i32 = arith.constant 0 : i32
    %c0_i32_0 = arith.constant 0 : i32
    %c0_i32_1 = arith.constant 0 : i32
    return %arg0, %c0_i32, %c0_i32_0 : i32, i32, i32
  }
  func.func @transform_9(%arg0: i32) -> (i32, i32, i32) {
    %c0_i32 = arith.constant 0 : i32
    %c0_i32_0 = arith.constant 0 : i32
    %c0_i32_1 = arith.constant 0 : i32
    return %arg0, %c0_i32, %c0_i32_0 : i32, i32, i32
  }
  func.func @transform_10(%arg0: i32) -> (i32, i32, i32) {
    %c0_i32 = arith.constant 0 : i32
    %c0_i32_0 = arith.constant 0 : i32
    %c0_i32_1 = arith.constant 0 : i32
    return %arg0, %c0_i32, %c0_i32_0 : i32, i32, i32
  }
  func.func @transform_11(%arg0: i32) -> (i32, i32, i32) {
    %c0_i32 = arith.constant 0 : i32
    %c0_i32_0 = arith.constant 0 : i32
    %c0_i32_1 = arith.constant 0 : i32
    return %arg0, %c0_i32, %c0_i32_0 : i32, i32, i32
  }
  func.func @transform_12(%arg0: i32) -> (i32, i32, i32) {
    %c0_i32 = arith.constant 0 : i32
    %c0_i32_0 = arith.constant 0 : i32
    %c0_i32_1 = arith.constant 0 : i32
    return %arg0, %c0_i32, %c0_i32_0 : i32, i32, i32
  }
  func.func @transform_13(%arg0: i32) -> (i32, i32, i32) {
    %c0_i32 = arith.constant 0 : i32
    %c0_i32_0 = arith.constant 0 : i32
    %c0_i32_1 = arith.constant 0 : i32
    return %arg0, %c0_i32, %c0_i32_0 : i32, i32, i32
  }
  func.func @transform_14(%arg0: i32) -> (i32, i32) {
    %c0_i32 = arith.constant 0 : i32
    %c0_i32_0 = arith.constant 0 : i32
    %c0_i32_1 = arith.constant 0 : i32
    return %c0_i32, %c0_i32_0 : i32, i32
  }
}

module attributes {stable_mosaic.version = 11 : i64} {
  func.func @_pool_cls_kernel(%arg0: i32, %arg1: memref<2x128xbf16, #tpu.memory_space<vmem>>, %arg2: memref<128x128xbf16, #tpu.memory_space<vmem>>, %arg3: memref<1x128xf32, #tpu.memory_space<vmem>>, %arg4: memref<128x128xbf16, #tpu.memory_space<vmem>>, %arg5: memref<1x128xf32, #tpu.memory_space<vmem>>, %arg6: memref<2x128xf32, #tpu.memory_space<vmem>>) attributes {dimension_semantics = [#tpu.dimension_semantics<arbitrary>], iteration_bounds = array<i64: 1>, scalar_prefetch = 0 : i64, scratch_operands = 0 : i64, tpu.core_type = #tpu.core_type<tc>, window_params = [{pipeline_mode = #tpu.pipeline_mode<synchronous>, transform_indices = @transform_0, window_bounds = array<i64: 2, 128>}, {pipeline_mode = #tpu.pipeline_mode<synchronous>, transform_indices = @transform_1, window_bounds = array<i64: 128, 128>}, {pipeline_mode = #tpu.pipeline_mode<synchronous>, transform_indices = @transform_2, window_bounds = array<i64: 1, 128>}, {pipeline_mode = #tpu.pipeline_mode<synchronous>, transform_indices = @transform_3, window_bounds = array<i64: 128, 128>}, {pipeline_mode = #tpu.pipeline_mode<synchronous>, transform_indices = @transform_4, window_bounds = array<i64: 1, 128>}, {pipeline_mode = #tpu.pipeline_mode<synchronous>, transform_indices = @transform_5, window_bounds = array<i64: 2, 128>}]} {
    %c0 = arith.constant 0 : index
    %c0_0 = arith.constant 0 : index
    %0 = vector.load %arg1[%c0, %c0_0] : memref<2x128xbf16, #tpu.memory_space<vmem>>, vector<2x128xbf16>
    %c0_1 = arith.constant 0 : index
    %c0_2 = arith.constant 0 : index
    %1 = vector.load %arg2[%c0_1, %c0_2] : memref<128x128xbf16, #tpu.memory_space<vmem>>, vector<128x128xbf16>
    %cst = arith.constant dense<0.000000e+00> : vector<2x128xf32>
    %2 = tpu.matmul %0, %1, %cst {dimension_numbers = #tpu.dot_dimension_numbers<[1], [0], [0], [1], [0, 0, 1, 1], [], []>} : vector<2x128xbf16>, vector<128x128xbf16>, vector<2x128xf32> -> vector<2x128xf32>
    %c0_3 = arith.constant 0 : index
    %c0_4 = arith.constant 0 : index
    %3 = vector.load %arg3[%c0_3, %c0_4] : memref<1x128xf32, #tpu.memory_space<vmem>>, vector<1x128xf32>
    %4 = vector.broadcast %3 : vector<1x128xf32> to vector<2x128xf32>
    %5 = arith.addf %2, %4 : vector<2x128xf32>
    %6 = math.tanh %5 : vector<2x128xf32>
    %c0_5 = arith.constant 0 : index
    %c0_6 = arith.constant 0 : index
    %7 = vector.load %arg4[%c0_5, %c0_6] : memref<128x128xbf16, #tpu.memory_space<vmem>>, vector<128x128xbf16>
    %8 = arith.truncf %6 : vector<2x128xf32> to vector<2x128xbf16>
    %cst_7 = arith.constant dense<0.000000e+00> : vector<2x128xf32>
    %9 = tpu.matmul %8, %7, %cst_7 {dimension_numbers = #tpu.dot_dimension_numbers<[1], [0], [0], [1], [0, 0, 1, 1], [], []>} : vector<2x128xbf16>, vector<128x128xbf16>, vector<2x128xf32> -> vector<2x128xf32>
    %c0_8 = arith.constant 0 : index
    %c0_9 = arith.constant 0 : index
    %10 = vector.load %arg5[%c0_8, %c0_9] : memref<1x128xf32, #tpu.memory_space<vmem>>, vector<1x128xf32>
    %11 = vector.broadcast %10 : vector<1x128xf32> to vector<2x128xf32>
    %12 = arith.addf %9, %11 : vector<2x128xf32>
    %c0_10 = arith.constant 0 : index
    %c0_11 = arith.constant 0 : index
    %13 = vector.load %arg6[%c0_10, %c0_11] : memref<2x128xf32, #tpu.memory_space<vmem>>, vector<2x128xf32>
    tpu.vector_store %arg6[%c0_10, %c0_11], %12 {strides = array<i32>} : memref<2x128xf32, #tpu.memory_space<vmem>>, vector<2x128xf32>,
    return
  }
  func.func @transform_0(%arg0: i32) -> (i32, i32) {
    %c0_i32 = arith.constant 0 : i32
    %c0_i32_0 = arith.constant 0 : i32
    %c0_i32_1 = arith.constant 0 : i32
    return %c0_i32, %c0_i32_0 : i32, i32
  }
  func.func @transform_1(%arg0: i32) -> (i32, i32) {
    %c0_i32 = arith.constant 0 : i32
    %c0_i32_0 = arith.constant 0 : i32
    %c0_i32_1 = arith.constant 0 : i32
    return %c0_i32, %c0_i32_0 : i32, i32
  }
  func.func @transform_2(%arg0: i32) -> (i32, i32) {
    %c0_i32 = arith.constant 0 : i32
    %c0_i32_0 = arith.constant 0 : i32
    %c0_i32_1 = arith.constant 0 : i32
    return %c0_i32, %c0_i32_0 : i32, i32
  }
  func.func @transform_3(%arg0: i32) -> (i32, i32) {
    %c0_i32 = arith.constant 0 : i32
    %c0_i32_0 = arith.constant 0 : i32
    %c0_i32_1 = arith.constant 0 : i32
    return %c0_i32, %c0_i32_0 : i32, i32
  }
  func.func @transform_4(%arg0: i32) -> (i32, i32) {
    %c0_i32 = arith.constant 0 : i32
    %c0_i32_0 = arith.constant 0 : i32
    %c0_i32_1 = arith.constant 0 : i32
    return %c0_i32, %c0_i32_0 : i32, i32
  }
  func.func @transform_5(%arg0: i32) -> (i32, i32) {
    %c0_i32 = arith.constant 0 : i32
    %c0_i32_0 = arith.constant 0 : i32
    %c0_i32_1 = arith.constant 0 : i32
    return %c0_i32, %c0_i32_0 : i32, i32
  }
}

</mosaic_0001>

<bundles_post_ra>
// kernel: bert_forward.3
= control target key start
LH: loop header
LB: loop body
LE: loop exit
PB: predicated region body
PF: predicated region fallthrough
CT: control target
= control target key end

     0   :  { %10 = vsyncpa [#allocation3], 0  ;;  %s577_s0 = inlined_call_operand.vmem [shape: f32[16,128], index: 0, kind: input, shape index: {}]   ;;  %s578_s1 = inlined_call_operand.vmem [shape: f32[8,128], index: 1, kind: input, shape index: {}]   ;;  %s579_s2 = inlined_call_operand.vmem [shape: f32[1,128], index: 2, kind: input, shape index: {}]   ;;  %s580_s3 = inlined_call_operand.hbm [shape: f32[1,128], index: 3, kind: input, shape index: {}]   ;;  %s581_s4 = inlined_call_operand.hbm [shape: f32[1,128], index: 4, kind: input, shape index: {}]   ;;  %s582_s5 = inlined_call_operand.vmem [shape: bf16[16,128], index: 5, kind: output, shape index: {}]  }
   0x1   :  { %11 = vsyncpa [#allocation5], 0  ;;  %s509_s18 = smov 0  }
   0x2 LB: > { %s515_s19 = sadd.s32 4294967295, %s475_s18   ;;  %p364_p0 = scmp.ge.s32.totalorder %s475_s18, 1  ;;  %s475_s18 = sphi %s509_s18, %s17_s18  }
   0x3   : > { %p158_p1 = scmp.lt.s32.totalorder %s475_s18, 3  ;;  %p583_p2 = scmp.eq.s32.totalorder %s515_s19, 0 }
   0x4   : > { %s477_s21 = smov [#allocation2]   ;;  %s478_s23 = smov [#allocation4]  }
   0x5   : > { %p520_p3 = pnand %p364_p0, %p158_p1  ;;  %s177_s22 = sshll.u32 %s477_s21, 4  ;;  %s178_s22 = int_to_ptr.vmem [resolvable:$true] %s177_s22 }
   0x6   : > { %s188_s24 = sshll.u32 %s478_s23, 4  ;;  %s420_s26 = scalar_lea.vmem %s178_s22, 16  ;;  %s189_s24 = int_to_ptr.vmem [resolvable:$true] %s188_s24 }
   0x7   : > { %p386_p4 = pneg %p520_p3  ;;  %p421_p7 = scmp.ne.s32.totalorder %s178_s22, %s420_s26 }
   0x8   : > { %s427_s27 = scalar_lea.vmem %s178_s22, 32  ;;  %p428_p10 = scmp.lt.s32.totalorder %s178_s22, %s178_s22 }
   0x9   : > { %p528_p5 = pnand %p583_p2, %p386_p4  ;;  %p429_p11 = scmp.lt.s32.totalorder %s427_s27, %s420_s26 }
   0xb   : > { %p411_p6 = pneg %p528_p5  ;;  %p430_p12 = por %p429_p11, %p428_p10 }
   0xd   : > { %p423_p8 = pnand %p421_p7, %p411_p6 }
   0xf   : > { %p424_p9 = pneg %p423_p8 }
  0x11   : > { %p431_p13 = pnand %p430_p12, %p424_p9 }
  0x13   : > { %434 = shalt.err (!%p431_p13)
}
  0x14   : > { %389 = dma.hbm_to_vmem [thread:$0]  (!%p528_p5), %s580_s3, 16, %s178_s22, [#allocation3]  }
  0x15   : > { %s446_s30 = scalar_lea.vmem %s189_s24, 16  ;;  %s453_s6 = scalar_lea.vmem %s189_s24, 32 }
  0x16   : > { %p447_p0 = scmp.ne.s32.totalorder %s189_s24, %s446_s30  ;;  %p454_p7 = scmp.lt.s32.totalorder %s189_s24, %s189_s24 }
  0x17   : > { %p455_p8 = scmp.lt.s32.totalorder %s453_s6, %s446_s30 }
  0x18   : > { %p449_p1 = pnand %p447_p0, %p411_p6 }
  0x19   : > { %p456_p2 = por %p455_p8, %p454_p7 }
  0x1a   : > { %p450_p4 = pneg %p449_p1 }
  0x1c   : > { %p457_p10 = pnand %p456_p2, %p450_p4 }
  0x1e   : > { %460 = shalt.err (!%p457_p10)
}
  0x1f   : > { %392 = dma.hbm_to_vmem [thread:$0]  (!%p528_p5), %s581_s4, 16, %s189_s24, [#allocation5]  }
  0x20   : > { %208 = sbr.rel (%p520_p3) target bundleno = 361 (0x169), region = 40  ;;  %p586_p9 = scmp.eq.s32.totalorder (!%p520_p3), %s515_s19, 0 }
  0x25   : > { %466 = dma.done.wait (%p586_p9), [#allocation3], 16   ;;  %p587_p6 = pmov %p586_p9 }
  0x27   : > { %468 = vsyncadd (%p587_p6), [#allocation3], 4294967280  ;;  %p588_p11 = pmov %p587_p6 }
  0x28   : > { %p589_p2 = pmov %p587_p6 }
  0x29   : > { %470 = dma.done.wait (%p588_p11), [#allocation5], 16  }
  0x2a   : > { %472 = vsyncadd (%p589_p2), [#allocation5], 4294967280  ;;  %p238_p12 = scmp.lt.s32.totalorder %s515_s19, 1  ;;  %v247_v1 = vld [vmem:[%s578_s1] sm:$0xff] }
  0x2b   : > { %v373_v2 = vld [vmem:[%s579_s2] ss:$0 sm:$0xff]  ;;  %v375_v15 = vld [vmem:[#allocation4] ss:$0 sm:$0xff] }
  0x2c   : > { %s591_s19 = smov (!%p238_p12, %s515_s19), 1  ;;  %v374_v13 = vld [vmem:[#allocation2] ss:$0 sm:$0xff] }
  0x2d   : > { %s371_s9 = sshll.u32 %s591_s19, 3  ;;  %s372_s17 = sshll.u32 %s591_s19, 2 }
  0x2e   : > { %s241_s12 = scalar_lea.vmem %s577_s0, %s371_s9  ;;  %s245_s22 = scalar_lea.vmem %s582_s5, %s372_s17 }
  0x2f   : > { %v246_v0 = vld [vmem:[%s241_s12] sm:$0xff] }
  0x30   : > { %v248_v3 = vadd.f32 %v247_v1, %v246_v0 }
  0x32   : > { %v256_v4 = vadd.f32 %v373_v2, %v248_v3 }
  0x34   : > { %259 = vadd.xlane.f32.xlu0 %v256_v4 }
  0xbd   : > { %v260_v5 = vpop.xlane.xlu0 %259 }
  0xbe   : > { %v262_v6 = vmul.f32 0.0078125, %v260_v5 }
  0xc0   : > { %v263_v7 = vsub.f32 %v256_v4, %v262_v6 }
  0xc2   : > { %v264_v8 = vmul.f32 %v263_v7, %v263_v7 }
  0xc4   : > { %265 = vadd.xlane.f32.xlu0 %v264_v8 }
 0x14d   : > { %v266_v9 = vpop.xlane.xlu0 %265 }
 0x14e   : > { %v267_v10 = vmul.f32 0.0078125, %v266_v9 }
 0x150   : > { %v268_v11 = vadd.f32 1e-12, %v267_v10 }
 0x152   : > { %407 = vrsqrt.f32 %v268_v11 }
 0x15f   : > { %v408_v12 = vpop.eup %407 }
 0x160   : > { %v270_v14 = vmul.f32 %v408_v12, %v263_v7 }
 0x162   : > { %v277_v16 = vmul.f32 %v374_v13, %v270_v14 }
 0x164   : > { %v284_v17 = vadd.f32 %v375_v15, %v277_v16 }
 0x166   : > { %v285_v18 = vpack.c.bf16 %v284_v17, %v284_v17 }
 0x168   : > { %286 = vst [vmem:[%s245_s22] sm:$0xf] %v285_v18 }
 0x169 PF: > { %s17_s18 = sadd.s32 1, %s475_s18  }
 0x16a   : > { %p14_p3 = scmp.ge.s32.totalorder %s17_s18, 4  }
 0x16c   :  { %16 = sbr.rel (!%p14_p3) target bundleno = 2 (0x2), region = 79 }
 0x171   :  { %306 = vsyncpa [#allocation3], 1 }
 0x172   :  { %308 = vsyncpa [#allocation3 + $0x1], 1 }
 0x173   :  { %309 = vsyncpa [#allocation5], 1 }

// kernel: bert_forward.5
= control target key start
LH: loop header
LB: loop body
LE: loop exit
PB: predicated region body
PF: predicated region fallthrough
CT: control target
= control target key end

     0   :  { %v381_v1 = vmov 0.0   ;;  %vm382_vm0 = vmmov 0   ;;  %s474_s0 = inlined_call_operand.vmem [shape: bf16[2,128], index: 0, kind: input, shape index: {}]   ;;  %s475_s1 = inlined_call_operand.vmem [shape: bf16[128,128], index: 1, kind: input, shape index: {}]   ;;  %s476_s2 = inlined_call_operand.vmem [shape: f32[1,128], index: 2, kind: input, shape index: {}]   ;;  %s477_s3 = inlined_call_operand.vmem [shape: bf16[128,128], index: 3, kind: input, shape index: {}]   ;;  %s478_s4 = inlined_call_operand.vmem [shape: f32[1,128], index: 4, kind: input, shape index: {}]   ;;  %s479_s5 = inlined_call_operand.hbm [shape: f32[2,128], index: 5, kind: output, shape index: {}]  }
   0x1   :  { %v341_v0 = vld [vmem:[%s475_s1 + $0x38] sm:$0xff]   ;;  %298 = vmatprep.subr.bf16.mxu0 %v381_v1  ;;  %318 = vmatprep.subr.bf16.mxu1 %v381_v1  ;;  %v342_v2 = vld [vmem:[%s475_s1 + $0x30] sm:$0xff]   ;;  %v343_v3 = vld [vmem:[%s475_s1 + $0x28] sm:$0xff]  }
   0x2   :  { %299 = vmatpush3.bf16.msra.mxu0 %v341_v0  ;;  %314 = vmatprep.mubr.msk.bf16.mxu0 %vm382_vm0, %v381_v1  ;;  %v349_v4 = vld [vmem:[%s477_s3 + $0x38] sm:$0xff]   ;;  %v344_v5 = vld [vmem:[%s475_s1 + $0x20] sm:$0xff]   ;;  %v350_v6 = vld [vmem:[%s477_s3 + $0x30] sm:$0xff]  }
   0x3   :  { %300 = vmatprep.subr.bf16.mxu0 %v381_v1  ;;  %334 = vmatprep.mubr.msk.bf16.mxu1 %vm382_vm0, %v381_v1  ;;  %v345_v7 = vld [vmem:[%s475_s1 + $0x18] sm:$0xff]   ;;  %v351_v8 = vld [vmem:[%s477_s3 + $0x28] sm:$0xff]  }
   0x4   :  { %319 = vmatpush3.bf16.msra.mxu1 %v349_v4 }
   0x5   :  { %320 = vmatprep.subr.bf16.mxu1 %v381_v1 }
   0x6   :  { %301 = vmatpush3.bf16.msra.mxu0 %v342_v2 }
   0x7   :  { %302 = vmatprep.subr.bf16.mxu0 %v381_v1 }
   0x8   :  { %321 = vmatpush3.bf16.msra.mxu1 %v350_v6 }
   0xa   :  { %303 = vmatpush3.bf16.msra.mxu0 %v343_v3 }
   0xb   :  { %304 = vmatprep.subr.bf16.mxu0 %v381_v1 }
   0xe   :  { %305 = vmatpush3.bf16.msra.mxu0 %v344_v5 }
   0xf   :  { %306 = vmatprep.subr.bf16.mxu0 %v381_v1 }
  0x10   :  { %10 = vsyncpa [#allocation3], 0  ;;  %322 = vmatprep.subr.bf16.mxu1 %v381_v1  ;;  %v346_v9 = vld [vmem:[%s475_s1 + $0x10] sm:$0xff]   ;;  %v347_v10 = vld [vmem:[%s475_s1 + $0x8] sm:$0xff]  }
  0x11   :  { %323 = vmatpush3.bf16.msra.mxu1 %v351_v8  ;;  %v348_v11 = vld [vmem:[%s475_s1] sm:$0xff]   ;;  %v353_v14 = vld [vmem:[%s477_s3 + $0x18] sm:$0xff]   ;;  %v354_v15 = vld [vmem:[%s477_s3 + $0x10] sm:$0xff]  }
  0x12   :  { %307 = vmatpush3.bf16.msra.mxu0 %v345_v7  ;;  %324 = vmatprep.subr.bf16.mxu1 %v381_v1  ;;  %v22_v12 = vld [vmem:[%s474_s0] sm:$0x1]  ;;  %v355_v16 = vld [vmem:[%s477_s3 + $0x8] sm:$0xff]  }
  0x13   :  { %308 = vmatprep.subr.bf16.mxu0 %v381_v1  ;;  %v352_v13 = vld [vmem:[%s477_s3 + $0x20] sm:$0xff]  }
  0x14   :  { %v356_v17 = vld [vmem:[%s477_s3] sm:$0xff]   ;;  %s383_s3 = smov [#allocation2]  }
  0x15   :  { %325 = vmatpush3.bf16.msra.mxu1 %v352_v13  ;;  %v262_v18 = vld [vmem:[%s476_s2] ss:$0 sm:$0xff]  ;;  %s254_s29 = sshll.u32 %s383_s3, 4  ;;  %s255_s29 = int_to_ptr.vmem [resolvable:$true] %s254_s29 }
  0x16   :  { %309 = vmatpush3.bf16.msra.mxu0 %v346_v9  ;;  %326 = vmatprep.subr.bf16.mxu1 %v381_v1  ;;  %v271_v26 = vld [vmem:[%s478_s4] ss:$0 sm:$0xff]  ;;  %s359_s2 = scalar_lea.vmem %s255_s29, 32  ;;  %p364_p1 = scmp.lt.s32.totalorder %s255_s29, %s255_s29 }
  0x17   :  { %310 = vmatprep.subr.bf16.mxu0 %v381_v1  ;;  %p360_p0 = scmp.ne.s32.totalorder %s255_s29, %s359_s2  ;;  %p365_p2 = scmp.lt.s32.totalorder %s359_s2, %s359_s2 }
  0x19   :  { %327 = vmatpush3.bf16.msra.mxu1 %v353_v14  ;;  %p366_p3 = por %p365_p2, %p364_p1 }
  0x1a   :  { %311 = vmatpush3.bf16.msra.mxu0 %v347_v10  ;;  %328 = vmatprep.subr.bf16.mxu1 %v381_v1 }
  0x1b   :  { %312 = vmatprep.subr.bf16.mxu0 %v381_v1  ;;  %p367_p4 = pnand %p366_p3, %p360_p0 }
  0x1d   :  { %329 = vmatpush3.bf16.msra.mxu1 %v354_v15 }
  0x1e   :  { %313 = vmatpush3.bf16.msra.mxu0 %v348_v11  ;;  %330 = vmatprep.subr.bf16.mxu1 %v381_v1 }
  0x21   :  { %315 = vmatmul.mubr.bf16.vlgmr.msra.gmra.mxu0 %v22_v12  ;;  %331 = vmatpush3.bf16.msra.mxu1 %v355_v16 }
  0x22   :  { %332 = vmatprep.subr.bf16.mxu1 %v381_v1 }
  0x25   :  { %333 = vmatpush3.bf16.msra.mxu1 %v356_v17 }
  0xe1   :  { %v128_v19 = vpop.f32.mrf.mxu0 }
  0xe2   :  { %v129_v20 = vadd.f32 %v262_v18, %v128_v19 }
  0xe3   :  { %v316_v21 = vpop.f32.mrf.mxu0 }
  0xe4   :  { %357 = vtanh.f32 %v129_v20 }
  0xe5   :  { %v131_v22 = vpop.f32.mrf.mxu0 }
  0xe7   :  { %v317_v23 = vpop.f32.mrf.mxu0 }
  0xf1   :  { %v358_v24 = vpop.eup %357 }
  0xf2   :  { %v151_v25 = vpack.c.bf16 %v358_v24, %v358_v24 }
  0xf4   :  { %335 = vmatmul.mubr.bf16.vlgmr.msra.gmra.mxu1 %v151_v25 }
 0x1b4   :  { %v241_v27 = vpop.f32.mrf.mxu1 }
 0x1b5   :  { %v242_v28 = vadd.f32 %v271_v26, %v241_v27 }
 0x1b6   :  { %v336_v29 = vpop.f32.mrf.mxu1 }
 0x1b7   :  { %247 = vst [vmem:[#allocation2] sm:$0x3] %v242_v28 }
 0x1b8   :  { %v244_v30 = vpop.f32.mrf.mxu1 }
 0x1b9   :  { %370 = shalt.err (!%p367_p4)
}
 0x1ba   :  { %257 = dma.vmem_to_hbm [thread:$0]  %s255_s29, 32, %s479_s5, [#allocation3]   ;;  %v337_v31 = vpop.f32.mrf.mxu1 }
 0x1bb   :  { %379 = dma.done.wait [#allocation3], 32  }
 0x1bc   :  { %380 = vsyncadd [#allocation3], 4294967264 }
 0x1bd   :  { %261 = vsyncpa [#allocation3], 1 }

// kernel: bert_forward.4
= control target key start
LH: loop header
LB: loop body
LE: loop exit
PB: predicated region body
PF: predicated region fallthrough
CT: control target
= control target key end

     0   :  { %s3298_s0 = inlined_call_operand.vmem [shape: f32[2,1,8], index: 0, kind: input, shape index: {}]   ;;  %s3299_s1 = inlined_call_operand.vmem [shape: bf16[16,128], index: 1, kind: input, shape index: {}]   ;;  %s3300_s2 = inlined_call_operand.hbm [shape: bf16[2,128,384], index: 2, kind: input, shape index: {}]   ;;  %s3301_s3 = inlined_call_operand.vmem [shape: f32[2,1,384], index: 3, kind: input, shape index: {}]   ;;  %s3302_s4 = inlined_call_operand.hbm [shape: bf16[2,128,128], index: 4, kind: input, shape index: {}]   ;;  %s3303_s5 = inlined_call_operand.vmem [shape: f32[2,1,128], index: 5, kind: input, shape index: {}]   ;;  %s3304_s6 = inlined_call_operand.vmem [shape: f32[2,1,128], index: 6, kind: input, shape index: {}]   ;;  %s3305_s7 = inlined_call_operand.vmem [shape: f32[2,1,128], index: 7, kind: input, shape index: {}]   ;;  %s3306_s8 = inlined_call_operand.vmem [shape: bf16[2,128,256], index: 8, kind: input, shape index: {}]   ;;  %s3307_s9 = inlined_call_operand.vmem [shape: f32[2,1,256], index: 9, kind: input, shape index: {}]   ;;  %s3308_s10 = inlined_call_operand.hbm [shape: bf16[2,256,128], index: 10, kind: input, shape index: {}]   ;;  %s3309_s11 = inlined_call_operand.vmem [shape: f32[2,1,128], index: 11, kind: input, shape index: {}]   ;;  %s3310_s12 = inlined_call_operand.vmem [shape: f32[2,1,128], index: 12, kind: input, shape index: {}]   ;;  %s3311_s13 = inlined_call_operand.vmem [shape: f32[2,1,128], index: 13, kind: input, shape index: {}]   ;;  %s3312_s14 = inlined_call_operand.vmem [shape: bf16[16,128], index: 14, kind: output, shape index: {}]  }
   0x1   :  { %3320 = sst [smem:[#allocation13_spill]] %s3298_s0 }
   0x2   :  { %3321 = sst [smem:[#allocation14_spill]] %s3299_s1 }
   0x3   :  { %3322 = sst [smem:[#allocation15_spill]] %s3300_s2 }
   0x4   :  { %3323 = sst [smem:[#allocation16_spill]] %s3301_s3 }
   0x5   :  { %3324 = sst [smem:[#allocation17_spill]] %s3302_s4 }
   0x6   :  { %3325 = sst [smem:[#allocation18_spill]] %s3308_s10 }
   0x7   :  { %3326 = sst [smem:[#allocation19_spill]] %s3310_s12 }
   0x8   :  { %3327 = sst [smem:[#allocation20_spill]] %s3311_s13 }
   0x9   :  { %3328 = sst [smem:[#allocation21_spill]] %s3312_s14 }
   0xa   :  { %19 = vsyncpa [#allocation4], 0 }
   0xb   :  { %21 = vsyncpa [#allocation4 + $0x1], 0 }
   0xc   :  { %22 = vsyncpa [#allocation6], 0 }
   0xd   :  { %24 = vsyncpa [#allocation6 + $0x1], 0  ;;  %s2837_s29 = smov 0   ;;  %s2839_s30 = smov 0  }
   0xe   :  { %s2841_s15 = smov 0   ;;  %s2843_s16 = smov 0  }
   0xf LB: > { %3329 = sst [smem:[#allocation10_spill]] %s2745_s15  ;;  %s2856_s17 = sadd.s32 4294967295, %s2749_s16   ;;  %s2749_s16 = sphi %s2843_s16, %s3354_s16   ;;  %s2745_s15 = sphi %s2841_s15, %s3356_s15   ;;  %s2741_s30 = sphi %s2839_s30, %s3358_s30   ;;  %s2737_s29 = sphi %s2837_s29, %s3357_s29  }
  0x10   : > { %s2859_s18 = sadd.s32 1, %s2749_s16   ;;  %s79_s20 = sadd.s32 1, %s2745_s15 }
  0x11   : > { %3330 = sst [smem:[#allocation11_spill]] %s2859_s18  ;;  %s76_s19 = ssub.s32 %s2749_s16, %s2859_s18 }
  0x12   : > { %p77_p0 = scmp.eq.s32.totalorder %s76_s19, 0  ;;  %p86_p1 = scmp.ne.s32.totalorder %s2745_s15, %s2741_s30 }
  0x13   : > { %p87_p2 = scmp.eq.s32.totalorder %s2749_s16, 0  ;;  %p92_p3 = scmp.ne.s32.totalorder %s2741_s30, %s2737_s29 }
  0x14   : > { %s2869_s21 = scalar_select %p77_p0, %s2745_s15, %s79_s20  }
  0x15   : > { %p88_p4 = por %p87_p2, %p86_p1  ;;  %p93_p5 = scmp.eq.s32.totalorder %s2856_s17, 0 }
  0x16   : > { %3331 = sst [smem:[#allocation12_spill]] %s2869_s21  ;;  %p2469_p6 = scmp.lt.s32.totalorder %s2749_s16, 2 }
  0x17   : > { %p2873_p7 = por %p93_p5, %p92_p3  ;;  %s2878_s23 = sand.u32 1, %s2745_s15  }
  0x18   : > { %p2880_p8 = pnand %p2469_p6, %p88_p4  ;;  %s457_s25 = sand.u32 1, %s2749_s16  }
  0x19   : > { %s3332_s22 = scalar_select %p2873_p7, 1, 0 }
  0x1a   : > { %s2195_s26 = sshll.u32 %s2878_s23, 6  ;;  %s2291_s27 = sshll.u32 %s2749_s16, 10 }
  0x1b   : > { %s461_s28 = scalar_lea.vmem [#allocation5], %s2195_s26  ;;  %s3334_s4 = sld [smem:[#allocation17_spill]] }
  0x1c   : > { %s468_s29 = sshll.u32 %s461_s28, 4  ;;  %s2894_s15 = scalar_lea.sflag [#allocation6], %s457_s25  ;;  %s2892_s29 = int_to_ptr.vmem [resolvable:$true] %s468_s29 }
  0x1d   : > { %p2900_p10 = pneg %p2880_p8 }
  0x21   : > { %s2890_s21 = scalar_lea.hbm %s3334_s4, %s2291_s27  ;;  %s2632_s28 = scalar_lea.hbm %s3334_s4, 2048 }
  0x22   : > { %s2627_s18 = scalar_lea.hbm %s2890_s21, 1024  ;;  %p2633_p13 = scmp.lt.s32.totalorder %s2890_s21, %s3334_s4 }
  0x23   : > { %p2628_p9 = scmp.ne.s32.totalorder %s2890_s21, %s2627_s18  ;;  %p2634_p0 = scmp.lt.s32.totalorder %s2632_s28, %s2627_s18 }
  0x25   : > { %p2630_p11 = pnand %p2900_p10, %p2628_p9  ;;  %p2635_p1 = por %p2634_p0, %p2633_p13 }
  0x27   : > { %p2631_p12 = pneg %p2630_p11 }
  0x29   : > { %p2636_p2 = pnand %p2635_p1, %p2631_p12 }
  0x2b   : > { %2639 = shalt.err (!%p2636_p2)
}
  0x2c   : > { %s2640_s25 = scalar_lea.vmem %s2892_s29, 1024  ;;  %s2751_s0 = smov [#allocation5]  }
  0x2d   : > { %p2641_p3 = scmp.ne.s32.totalorder %s2892_s29, %s2640_s25  ;;  %s2645_s26 = sshll.u32 %s2751_s0, 4  ;;  %s2646_s26 = int_to_ptr.vmem [resolvable:$false] %s2645_s26 }
  0x2e   : > { %s2647_s27 = scalar_lea.vmem %s2646_s26, 2048  ;;  %p2648_p6 = scmp.lt.s32.totalorder %s2892_s29, %s2646_s26 }
  0x2f   : > { %p2643_p4 = pnand %p2641_p3, %p2900_p10  ;;  %p2649_p9 = scmp.lt.s32.totalorder %s2647_s27, %s2640_s25 }
  0x31   : > { %p2644_p5 = pneg %p2643_p4  ;;  %p2650_p11 = por %p2649_p9, %p2648_p6 }
  0x33   : > { %p2651_p7 = pnand %p2650_p11, %p2644_p5 }
  0x35   : > { %2654 = shalt.err (!%p2651_p7)
}
  0x36   : > { %s3318_s18 = smov 64   ;;  %s3319_s28 = smov 4  }
  0x37   : > { %2465 = dma.hbm_to_vmem [thread:$0]  (!%p2880_p8), %s2890_s21, 1024, %s2892_s29, %s2894_s15, %s3318_s18, %s3318_s18, %s3319_s28  }
  0x38   : > { %p2201_p12 = scmp.ge.s32.totalorder %s2749_s16, 1  ;;  %p548_p13 = scmp.lt.s32.totalorder %s2749_s16, 3 }
  0x39   : > { %s2449_s0 = smul.u32 192, %s2878_s23  ;;  %s3337_s2 = sld [smem:[#allocation15_spill]] }
  0x3a   : > { %p2929_p7 = pnand %p2201_p12, %p548_p13  ;;  %s2450_s20 = smul.u32 3072, %s2749_s16 }
  0x3b   : > { %s433_s4 = scalar_lea.vmem [#allocation3], %s2449_s0  ;;  %s430_s21 = scalar_lea.sflag [#allocation4], %s2878_s23 }
  0x3c   : > { %s3336_s19 = scalar_select %p2929_p7, 1, 0 }
  0x3d   : > { %s440_s1 = sshll.u32 %s433_s4, 4  ;;  %s2939_s1 = int_to_ptr.vmem [resolvable:$true] %s440_s1 }
  0x3f   : > { %s2937_s27 = scalar_lea.hbm %s3337_s2, %s2450_s20  ;;  %s2660_s13 = scalar_lea.hbm %s3337_s2, 6144 }
  0x40   : > { %s2655_s29 = scalar_lea.hbm %s2937_s27, 3072  ;;  %p2661_p3 = scmp.lt.s32.totalorder %s2937_s27, %s3337_s2 }
  0x41   : > { %p2656_p0 = scmp.ne.s32.totalorder %s2937_s27, %s2655_s29  ;;  %p2662_p4 = scmp.lt.s32.totalorder %s2660_s13, %s2655_s29 }
  0x43   : > { %p2658_p1 = pnand %p2656_p0, %p2900_p10  ;;  %p2663_p5 = por %p2662_p4, %p2661_p3 }
  0x45   : > { %p2659_p2 = pneg %p2658_p1 }
  0x47   : > { %p2664_p6 = pnand %p2663_p5, %p2659_p2 }
  0x49   : > { %2667 = shalt.err (!%p2664_p6)
}
  0x4a   : > { %s2668_s4 = scalar_lea.vmem %s2939_s1, 3072  ;;  %s2754_s0 = smov [#allocation3]  }
  0x4b   : > { %p2669_p9 = scmp.ne.s32.totalorder %s2939_s1, %s2668_s4  ;;  %s2673_s18 = sshll.u32 %s2754_s0, 4  ;;  %s2674_s18 = int_to_ptr.vmem [resolvable:$false] %s2673_s18 }
  0x4c   : > { %s2675_s28 = scalar_lea.vmem %s2674_s18, 6144  ;;  %p2676_p13 = scmp.lt.s32.totalorder %s2939_s1, %s2674_s18 }
  0x4d   : > { %p2671_p11 = pnand %p2669_p9, %p2900_p10  ;;  %p2677_p0 = scmp.lt.s32.totalorder %s2675_s28, %s2668_s4 }
  0x4f   : > { %p2672_p12 = pneg %p2671_p11  ;;  %p2678_p1 = por %p2677_p0, %p2676_p13 }
  0x51   : > { %p2679_p7 = pnand %p2678_p1, %p2672_p12 }
  0x53   : > { %2682 = shalt.err (!%p2679_p7)
}
  0x54   : > { %s2755_s13 = smov 192   ;;  %s2756_s26 = smov 12  }
  0x55   : > { %2462 = dma.hbm_to_vmem [thread:$0]  (!%p2880_p8), %s2937_s27, 3072, %s2939_s1, %s430_s21, %s2755_s13, %s2755_s13, %s2756_s26  }
  0x56   : > { %s2198_s29 = sshll.u32 %s2878_s23, 7  ;;  %s2292_s25 = sshll.u32 %s2749_s16, 11 }
  0x57   : > { %s3338_s10 = sld [smem:[#allocation18_spill]]  ;;  %s515_s18 = scalar_lea.vmem [#allocation7], %s2198_s29 }
  0x58   : > { %s522_s28 = sshll.u32 %s515_s18, 4  ;;  %s523_s28 = int_to_ptr.vmem [resolvable:$true] %s522_s28 }
  0x5d   : > { %s2969_s4 = scalar_lea.hbm %s3338_s10, %s2292_s25  ;;  %s2688_s16 = scalar_lea.hbm %s3338_s10, 4096 }
  0x5e   : > { %s2683_s2 = scalar_lea.hbm %s2969_s4, 2048  ;;  %p2689_p4 = scmp.lt.s32.totalorder %s2969_s4, %s3338_s10 }
  0x5f   : > { %p2684_p7 = scmp.ne.s32.totalorder %s2969_s4, %s2683_s2  ;;  %p2690_p5 = scmp.lt.s32.totalorder %s2688_s16, %s2683_s2 }
  0x61   : > { %p2686_p2 = pnand %p2684_p7, %p2900_p10  ;;  %p2691_p6 = por %p2690_p5, %p2689_p4 }
  0x63   : > { %p2687_p3 = pneg %p2686_p2 }
  0x65   : > { %p2692_p9 = pnand %p2691_p6, %p2687_p3 }
  0x67   : > { %2695 = shalt.err (!%p2692_p9)
}
  0x68   : > { %s2696_s21 = scalar_lea.vmem %s523_s28, 2048  ;;  %s2757_s13 = smov [#allocation7]  }
  0x69   : > { %p2697_p11 = scmp.ne.s32.totalorder %s523_s28, %s2696_s21  ;;  %s2701_s26 = sshll.u32 %s2757_s13, 4  ;;  %s2702_s26 = int_to_ptr.vmem [resolvable:$false] %s2701_s26 }
  0x6a   : > { %s2703_s29 = scalar_lea.vmem %s2702_s26, 4096  ;;  %p2704_p0 = scmp.lt.s32.totalorder %s523_s28, %s2702_s26 }
  0x6b   : > { %p2699_p12 = pnand %p2697_p11, %p2900_p10  ;;  %p2705_p1 = scmp.lt.s32.totalorder %s2703_s29, %s2696_s21 }
  0x6d   : > { %p2700_p13 = pneg %p2699_p12  ;;  %p2706_p7 = por %p2705_p1, %p2704_p0 }
  0x6f   : > { %p2707_p2 = pnand %p2706_p7, %p2700_p13 }
  0x71   : > { %2710 = shalt.err (!%p2707_p2)
}
  0x72   : > { %s3339_s2 = smov 4   ;;  %s3340_s12 = smov 64  }
  0x73   : > { %2468 = dma.hbm_to_vmem [thread:$0]  (!%p2880_p8), %s2969_s4, 2048, %s523_s28, %s2894_s15, %s3340_s12, %s3340_s12, %s3339_s2  }
  0x74   : > { %p3341_p10 = scmp.ne.s32.totalorder %s3336_s19, 0 }
  0x75   : > { %s554_s14 = sand.u32 (!%p3341_p10), 1, %s2741_s30   ;;  %p3342_p3 = scmp.ne.s32.totalorder (!%p3341_p10), %s3332_s22, 0 }
  0x76   : > { %552 = sbr.rel (%p3341_p10) target bundleno = 3002 (0xbba), region = 76  ;;  %s555_s20 = scalar_lea.sflag (!%p3341_p10), [#allocation4], %s554_s14 }
  0x77   : > { %s2451_s25 = smul.u32 (!%p3341_p10), 192, %s554_s14 }
  0x79   : > { %s2994_s0 = scalar_lea.vmem (!%p3341_p10), [#allocation3], %s2451_s25 }
  0x7b   : > { %2728 = dma.done.wait (%p3342_p3), %s555_s20, 3072  }
  0x7c   : > { %2730 = vsyncadd (%p3342_p3), %s555_s20, 4294964224  ;;  %s563_s24 = sand.u32 1, %s2856_s17   ;;  %s2202_s18 = sshll.u32 %s554_s14, 6 }
  0x7d   : > { %s564_s15 = scalar_lea.sflag [#allocation6], %s563_s24  ;;  %s3001_s4 = scalar_lea.vmem [#allocation5], %s2202_s18 }
  0x7e   : > { %2732 = dma.done.wait (%p3342_p3), %s564_s15, 3072  }
  0x7f   : > { %2734 = vsyncadd (%p3342_p3), %s564_s15, 4294964224  ;;  %s2203_s19 = sshll.u32 %s554_s14, 7  ;;  %p657_p8 = scmp.lt.s32.totalorder %s2856_s17, 1 }
  0x80   : > { %s3343_s3 = sld [smem:[#allocation16_spill]]  ;;  %p2207_p4 = scmp.ne.s32.totalorder %s2856_s17, 0 }
  0x81   : > { %s3009_s28 = scalar_select %p657_p8, %s2856_s17, 1 }
  0x82   : > { %s3345_s10 = sld [smem:[#allocation20_spill]] }
  0x83   : > { %s2452_s1 = smul.u32 3, %s3009_s28  ;;  %s2293_s20 = sshll.u32 %s3009_s28, 7 }
  0x84   : > { %s3033_s15 = scalar_lea.vmem %s3306_s8, %s2293_s20  ;;  %s2206_s16 = sshll.u32 %s3009_s28, 1 }
  0x85   : > { %s3039_s27 = scalar_lea.vmem %s3307_s9, %s2206_s16  ;;  %s681_s29 = scalar_lea.vmem %s3309_s11, %s3009_s28 }
  0x86   : > { %s3027_s25 = scalar_lea.vmem %s3343_s3, %s2452_s1  ;;  %s3344_s1 = sld [smem:[#allocation19_spill]] }
  0x87   : > { %s3053_s20 = scalar_lea.vmem [#allocation7], %s2203_s19  ;;  %s3346_s16 = sld [smem:[#allocation14_spill]] (!%p2207_p4) }
  0x88   : > { %s687_s24 = scalar_lea.vmem %s3345_s10, %s3009_s28  ;;  %692 = sbr.rel (%p2207_p4) target bundleno = 145 (0x91), region = 92 }
  0x8c   : > { %s684_s14 = scalar_lea.vmem %s3344_s1, %s3009_s28 }
  0x8d   : > { %v2297_v0 = vld [vmem:[%s3346_s16] sm:$0xff]  }
  0x8e   : > { %v2298_v1 = vunpack.c.l.bf16 %v2297_v0  ;;  %v2299_v2 = vunpack.c.h.bf16 %v2297_v0 }
  0x90   : > { %697 = vst [vmem:[#allocation2] sm:$0xff] %v2298_v1  ;;  %698 = vst [vmem:[#allocation2 + $0x8] sm:$0xff] %v2299_v2 }
  0x91 PF: > { %v2515_v3 = vld [vmem:[%s2994_s0 + $0xac] ss:$12 sps:$4 sm:$0xff]   ;;  %v2517_v4 = vld [vmem:[%s2994_s0 + $0xa8] ss:$12 sps:$4 sm:$0xff]   ;;  %v2758_v5 = vmov 0   ;;  %v2759_v6 = vmov 0.0   ;;  %v736_v32 = vlaneseq  ;;  %s3350_s1 = scalar_lea.vmem %s3305_s7, %s3009_s28 }
  0x92   : > { %911 = vmatprep.mubr.bf16.mxu0 %v2758_v5  ;;  %2361 = vmatprep.subr.bf16.mxu1 %v2759_v6  ;;  %v2518_v7 = vld [vmem:[%s2994_s0 + $0x94] ss:$12 sps:$4 sm:$0xff]   ;;  %v2520_v8 = vld [vmem:[%s2994_s0 + $0x90] ss:$12 sps:$4 sm:$0xff]   ;;  %v2523_v10 = vld [vmem:[%s2994_s0 + $0x78] ss:$12 sps:$4 sm:$0xff]  }
  0x93   : > { %879 = vmatprep.subr.bf16.mxu0 %v2515_v3  ;;  %v2521_v9 = vld [vmem:[%s2994_s0 + $0x7c] ss:$12 sps:$4 sm:$0xff]   ;;  %v2524_v11 = vld [vmem:[%s2994_s0 + $0x64] ss:$12 sps:$4 sm:$0xff]   ;;  %v2526_v12 = vld [vmem:[%s2994_s0 + $0x60] ss:$12 sps:$4 sm:$0xff]  }
  0x94   : > { %880 = vmatpush1.bf16.msra.mxu0 %v2517_v4  ;;  %v2527_v13 = vld [vmem:[%s2994_s0 + $0x4c] ss:$12 sps:$4 sm:$0xff]   ;;  %v2539_v14 = vld [vmem:[%s2994_s0 + $0xb0] ss:$12 sps:$4 sm:$0xff]   ;;  %v2529_v16 = vld [vmem:[%s2994_s0 + $0x48] ss:$12 sps:$4 sm:$0xff]  }
  0x95   : > { %881 = vmatprep.subr.bf16.mxu0 %v2518_v7  ;;  %2362 = vmatpush3.bf16.msra.mxu1 %v2539_v14  ;;  %v2540_v15 = vld [vmem:[%s2994_s0 + $0x98] ss:$12 sps:$4 sm:$0xff]   ;;  %v2530_v17 = vld [vmem:[%s2994_s0 + $0x34] ss:$12 sps:$4 sm:$0xff]   ;;  %v2532_v19 = vld [vmem:[%s2994_s0 + $0x30] ss:$12 sps:$4 sm:$0xff]  }
  0x96   : > { %2363 = vmatprep.subr.bf16.mxu1 %v2759_v6  ;;  %v2541_v18 = vld [vmem:[%s2994_s0 + $0x80] ss:$12 sps:$4 sm:$0xff]   ;;  %v2533_v20 = vld [vmem:[%s2994_s0 + $0x1c] ss:$12 sps:$4 sm:$0xff]   ;;  %v2535_v22 = vld [vmem:[%s2994_s0 + $0x18] ss:$12 sps:$4 sm:$0xff]  }
  0x97   : > { %v2542_v21 = vld [vmem:[%s2994_s0 + $0x68] ss:$12 sps:$4 sm:$0xff]   ;;  %v2536_v23 = vld [vmem:[%s2994_s0 + $0x4] ss:$12 sps:$4 sm:$0xff]   ;;  %v2538_v25 = vld [vmem:[%s2994_s0] ss:$12 sps:$4 sm:$0xff]  }
  0x98   : > { %882 = vmatpush1.bf16.msra.mxu0 %v2520_v8  ;;  %v2543_v24 = vld [vmem:[%s2994_s0 + $0x50] ss:$12 sps:$4 sm:$0xff]   ;;  %v2544_v28 = vld [vmem:[%s2994_s0 + $0x38] ss:$12 sps:$4 sm:$0xff]   ;;  %v2545_v30 = vld [vmem:[%s2994_s0 + $0x20] ss:$12 sps:$4 sm:$0xff]  }
  0x99   : > { %883 = vmatprep.subr.bf16.mxu0 %v2521_v9  ;;  %2364 = vmatpush3.bf16.msra.mxu1 %v2540_v15  ;;  %v3085_v26 = vld [vmem:[#allocation2] sm:$0xff]  ;;  %v3087_v27 = vld [vmem:[#allocation2 + $0x8] sm:$0xff]  ;;  %vm2760_vm0 = vmmov 0   ;;  %v3106_v33 = vshrl.u32 %v736_v32, 7  ;;  %vm969_vm1 = vcmask 523264   ;;  %s2761_s3 = smov 64  }
  0x9a   : > { %2365 = vmatprep.subr.bf16.mxu1 %v2759_v6  ;;  %v701_v29 = vpack.c.bf16 %v3087_v27, %v3085_v26  ;;  %v2546_v31 = vld [vmem:[%s2994_s0 + $0x8] ss:$12 sps:$4 sm:$0xff]   ;;  %2377 = vmatprep.mubr.msk.bf16.mxu1 %vm2760_vm0, %v2759_v6  ;;  %v734_v36 = vld [vmem:[%s3027_s25] sm:$0x7]  ;;  %vm1040_vm2 = vcmask 1043456   ;;  %s3347_s0 = sld [smem:[#allocation13_spill]]  ;;  %s3348_s25 = scalar_lea.vmem %s3303_s5, %s3009_s28 }
  0x9b   : > { %v742_v34 = vsub.s32 1, %v3106_v33  ;;  %v3110_v35 = vsub.s32 0, %v3106_v33  ;;  %v746_v53 = vsub.s32 2, %v3106_v33  ;;  %vm1024_vm3 = vcmask 64512   ;;  %s3353_s13 = sld [smem:[#allocation21_spill]] }
  0x9c   : > { %884 = vmatpush1.bf16.msra.mxu0 %v2523_v10 }
  0x9d   : > { %885 = vmatprep.subr.bf16.mxu0 %v2524_v11  ;;  %2366 = vmatpush3.bf16.msra.mxu1 %v2541_v18  ;;  %v743_v37 = vrot.slane %v734_v36, %v742_v34  ;;  %v739_v39 = vrot.slane %v734_v36, %v3110_v35  ;;  %v747_v54 = vrot.slane %v734_v36, %v746_v53 }
  0x9e   : > { %2367 = vmatprep.subr.bf16.mxu1 %v2759_v6 }
  0xa0   : > { %886 = vmatpush1.bf16.msra.mxu0 %v2526_v12  ;;  %v966_v63 = vld [vmem:[%s3347_s0] sm:$0x1] }
  0xa1   : > { %887 = vmatprep.subr.bf16.mxu0 %v2527_v13  ;;  %2368 = vmatpush3.bf16.msra.mxu1 %v2542_v21  ;;  %v967_v0 = vsub.f32 1.0, %v966_v63  ;;  %v2236_v21 = vld [vmem:[%s3347_s0 + $0x1] sm:$0x1] }
  0xa2   : > { %2369 = vmatprep.subr.bf16.mxu1 %v2759_v6 }
  0xa3   : > { %v968_v1 = vmul.f32 -10000.0, %v967_v0 }
  0xa4   : > { %888 = vmatpush1.bf16.msra.mxu0 %v2529_v16 }
  0xa5   : > { %889 = vmatprep.subr.bf16.mxu0 %v2530_v17  ;;  %2370 = vmatpush3.bf16.msra.mxu1 %v2543_v24  ;;  %v3138_v2 = vrot.slane %v968_v1, %v3110_v35 }
  0xa6   : > { %2371 = vmatprep.subr.bf16.mxu1 %v2759_v6 }
  0xa8   : > { %890 = vmatpush1.bf16.msra.mxu0 %v2532_v19 }
  0xa9   : > { %891 = vmatprep.subr.bf16.mxu0 %v2533_v20  ;;  %2372 = vmatpush3.bf16.msra.mxu1 %v2544_v28 }
  0xaa   : > { %2373 = vmatprep.subr.bf16.mxu1 %v2759_v6 }
  0xac   : > { %892 = vmatpush1.bf16.msra.mxu0 %v2535_v22  ;;  %v1209_v22 = vsub.f32 1.0, %v2236_v21 }
  0xad   : > { %893 = vmatprep.subr.bf16.mxu0 %v2536_v23  ;;  %2374 = vmatpush3.bf16.msra.mxu1 %v2545_v30 }
  0xae   : > { %2375 = vmatprep.subr.bf16.mxu1 %v2759_v6  ;;  %v1210_v23 = vmul.f32 -10000.0, %v1209_v22 }
  0xb0   : > { %894 = vmatpush1.bf16.msra.mxu0 %v2538_v25  ;;  %v1262_v25 = vrot.slane %v1210_v23, %v3110_v35 }
  0xb1   : > { %2405 = vmatprep.subr.bf16.mxu0 %v2759_v6  ;;  %2376 = vmatpush3.bf16.msra.mxu1 %v2546_v31 }
  0xb2   : > { %2381 = vmatprep.subr.bf16.mxu1 %v2759_v6 }
  0xb3   : > { %912 = vmatmul.mubr.bf16.vlgmr.msra.gmra.mxu0 %v701_v29 }
  0xb4   : > { %2407 = vmatprep.mubr.msk.bf16.mxu0 %vm2760_vm0, %v2759_v6  ;;  %2378 = vmatmul.mubr.bf16.vlgmr.msra.gmra.mxu1 %v701_v29 }
  0xb5   : > { %2383 = vmatprep.mubr.msk.bf16.mxu1 %vm2760_vm0, %v2759_v6 }
 0x173   : > { %v913_v38 = vpop.f32.mrf.mxu0 }
 0x174   : > { %v914_v43 = vadd.f32 %v913_v38, %v739_v39  ;;  %v956_v55 = vpop.f32.mrf.mxu1 }
 0x175   : > { %v915_v40 = vpop.f32.mrf.mxu0  ;;  %v957_v56 = vadd.f32 %v956_v55, %v747_v54 }
 0x176   : > { %v916_v41 = vadd.f32 %v915_v40, %v743_v37  ;;  %v963_v48 = vpack.c.bf16 %v914_v43, %v914_v43  ;;  %v2379_v57 = vpop.f32.mrf.mxu1 }
 0x177   : > { %v917_v42 = vpop.f32.mrf.mxu0  ;;  %v965_v58 = vpack.c.bf16 %v957_v56, %v957_v56 }
 0x178   : > { %v964_v44 = vpack.c.bf16 %v916_v41, %v916_v41  ;;  %v918_v49 = vadd.f32 %v917_v42, %v739_v39  ;;  %v959_v59 = vpop.f32.mrf.mxu1 }
 0x179   : > { %v919_v45 = vpop.f32.mrf.mxu0  ;;  %v1042_v60 = vsel %vm1040_vm2, %v965_v58, 0  ;;  %v3131_v61 = vadd.f32 %v959_v59, %v747_v54 }
 0x17a   : > { %v974_v46 = vsel %vm969_vm1, %v964_v44, 0  ;;  %v920_v47 = vadd.f32 %v919_v45, %v743_v37  ;;  %1088 = vrot.lane.b32.xlu1 %v964_v44, %s2761_s3  ;;  %v1204_v52 = vpack.c.bf16 %v918_v49, %v918_v49  ;;  %v2380_v62 = vpop.f32.mrf.mxu1 }
 0x17b   : > { %2382 = vmatpush3.bf16.xpose.msra.mxu1 %v974_v46 }
 0x17c   : > { %v1205_v50 = vpack.c.bf16 %v920_v47, %v920_v47  ;;  %2387 = vmatprep.subr.bf16.mxu1 %v2759_v6 }
 0x17e   : > { %v1215_v51 = vsel %vm969_vm1, %v1205_v50, 0  ;;  %1085 = vrot.lane.b32.xlu1 %v963_v48, %s2761_s3 }
 0x17f   : > { %2406 = vmatpush3.bf16.xpose.msra.mxu0 %v1215_v51 }
 0x180   : > { %2417 = vmatprep.subr.bf16.mxu0 %v2759_v6 }
 0x182   : > { %1324 = vrot.lane.b32.xlu1 %v1204_v52, %s2761_s3  ;;  %2384 = vmatmul.mubr.msk.bf16.vlgmr.msra.gmra.mxu1 %vm969_vm1, %v963_v48 }
 0x183   : > { %2389 = vmatprep.mubr.msk.bf16.mxu1 %vm2760_vm0, %v2759_v6  ;;  %2388 = vmatpush3.bf16.msra.mxu1 %v1042_v60 }
 0x184   : > { %2393 = vmatprep.subr.bf16.mxu1 %v2759_v6 }
 0x186   : > { %2408 = vmatmul.mubr.msk.bf16.vlgmr.msra.gmra.mxu0 %vm969_vm1, %v1204_v52 }
 0x187   : > { %2419 = vmatprep.mubr.msk.bf16.mxu0 %vm2760_vm0, %v2759_v6 }
 0x1ec   : > { %v1089_v30 = vpop.permute.xlu1 %1088 }
 0x1ed   : > { %v1094_v42 = vsel %vm969_vm1, %v1089_v30, 0 }
 0x1f0   : > { %v1086_v37 = vpop.permute.xlu1 %1085 }
 0x1f4   : > { %v1325_v38 = vpop.permute.xlu1 %1324 }
 0x242   : > { %v1010_v3 = vpop.f32.mrf.mxu1 }
 0x243   : > { %v1016_v4 = vmul.f32 0.125, %v1010_v3 }
 0x244   : > { %v2385_v7 = vpop.f32.mrf.mxu1 }
 0x245   : > { %v1023_v8 = vadd.f32 %v3138_v2, %v1016_v4 }
 0x246   : > { %v1013_v9 = vpop.f32.mrf.mxu1  ;;  %v1251_v10 = vpop.f32.mrf.mxu0 }
 0x247   : > { %v1025_v11 = vsel %vm1024_vm3, %v1023_v8, -inf  ;;  %v1257_v24 = vmul.f32 0.125, %v1251_v10 }
 0x248   : > { %v2409_v12 = vpop.f32.mrf.mxu0  ;;  %1026 = vmax.xlane.f32.xlu0 %v1025_v11  ;;  %v2386_v13 = vpop.f32.mrf.mxu1 }
 0x249   : > { %v1264_v28 = vadd.f32 %v1262_v25, %v1257_v24 }
 0x24a   : > { %v1254_v14 = vpop.f32.mrf.mxu0 }
 0x24b   : > { %v1265_v29 = vsel %vm1024_vm3, %v1264_v28, -inf }
 0x24c   : > { %v2410_v15 = vpop.f32.mrf.mxu0 }
 0x2d1   : > { %v1027_v16 = vpop.xlane.xlu0 %1026 }
 0x2d2   : > { %v1028_v17 = vsub.f32 %v1023_v8, %v1027_v16 }
 0x2d4   : > { %v1029_v18 = vmul.f32 1.442695, %v1028_v17  ;;  %v1206_v17 = vpack.c.bf16 %v3131_v61, %v3131_v61 }
 0x2d6   : > { %2595 = vpow2.f32 %v1029_v18 }
 0x2e3   : > { %v2596_v19 = vpop.eup %2595 }
 0x2e4   : > { %v1031_v20 = vsel %vm1024_vm3, %v2596_v19, 0.0 }
 0x2e5   : > { %1032 = vadd.xlane.f32.xlu0 %v1031_v20 }
 0x2fb   : > { %1327 = vrot.lane.b32.xlu0 %v1205_v50, %s2761_s3 }
 0x31a   : > { %1266 = vmax.xlane.f32.xlu0 %v1265_v29 }
 0x330   : > { %1151 = vrot.lane.b32.xlu0 %v965_v58, %s2761_s3 }
 0x36e   : > { %v1033_v31 = vpop.xlane.xlu0 %1032 }
 0x36f   : > { %2597 = vrcp.f32 %v1033_v31 }
 0x372   : > { %v1328_v32 = vpop.permute.xlu0 %1327 }
 0x373   : > { %v1333_v36 = vsel %vm969_vm1, %v1328_v32, 0 }
 0x374   : > { %2418 = vmatpush3.bf16.xpose.msra.mxu0 %v1333_v36 }
 0x375   : > { %2429 = vmatprep.subr.bf16.mxu0 %v2759_v6 }
 0x37b   : > { %2420 = vmatmul.mubr.msk.bf16.vlgmr.msra.gmra.mxu0 %vm969_vm1, %v1325_v38  ;;  %v2548_v38 = vld [vmem:[%s3001_s4 + $0x30] sm:$0xff]  }
 0x37c   : > { %v2598_v39 = vpop.eup %2597  ;;  %2445 = vmatprep.mubr.msk.bf16.mxu0 %vm2760_vm0, %v2759_v6 }
 0x37d   : > { %v1035_v40 = vmul.f32 %v2598_v39, %v2596_v19  ;;  %v2549_v39 = vld [vmem:[%s3001_s4 + $0x28] sm:$0xff]  }
 0x37f   : > { %v1036_v41 = vpack.c.bf16 %v1035_v40, %v1035_v40  ;;  %v2550_v40 = vld [vmem:[%s3001_s4 + $0x20] sm:$0xff]  }
 0x381   : > { %2390 = vmatmul.mubr.msk.bf16.vlgmr.msra.gmra.mxu1 %vm1024_vm3, %v1036_v41  ;;  %v2551_v41 = vld [vmem:[%s3001_s4 + $0x18] sm:$0xff]  }
 0x382   : > { %2394 = vmatpush3.bf16.xpose.msra.mxu1 %v1094_v42  ;;  %2395 = vmatprep.mubr.msk.bf16.mxu1 %vm2760_vm0, %v2759_v6  ;;  %v2553_v42 = vld [vmem:[%s3001_s4 + $0x8] sm:$0xff]  }
 0x383   : > { %2399 = vmatprep.subr.bf16.mxu1 %v2759_v6 }
 0x389   : > { %2396 = vmatmul.mubr.msk.bf16.vlgmr.msra.gmra.mxu1 %vm969_vm1, %v1086_v37  ;;  %v2547_v37 = vld [vmem:[%s3001_s4 + $0x38] sm:$0xff]  }
 0x38a   : > { %2401 = vmatprep.mubr.msk.bf16.mxu1 %vm2760_vm0, %v2759_v6  ;;  %2430 = vmatpush3.bf16.msra.mxu0 %v2547_v37 }
 0x38b   : > { %2431 = vmatprep.subr.bf16.mxu0 %v2759_v6 }
 0x38e   : > { %2432 = vmatpush3.bf16.msra.mxu0 %v2548_v38 }
 0x38f   : > { %2433 = vmatprep.subr.bf16.mxu0 %v2759_v6 }
 0x392   : > { %2434 = vmatpush3.bf16.msra.mxu0 %v2549_v39 }
 0x393   : > { %2435 = vmatprep.subr.bf16.mxu0 %v2759_v6 }
 0x396   : > { %2436 = vmatpush3.bf16.msra.mxu0 %v2550_v40 }
 0x397   : > { %2437 = vmatprep.subr.bf16.mxu0 %v2759_v6 }
 0x39a   : > { %2438 = vmatpush3.bf16.msra.mxu0 %v2551_v41 }
 0x39b   : > { %2439 = vmatprep.subr.bf16.mxu0 %v2759_v6 }
 0x3a3   : > { %v1267_v43 = vpop.xlane.xlu0 %1266 }
 0x3a4   : > { %v1268_v1 = vsub.f32 %v1264_v28, %v1267_v43 }
 0x3a6   : > { %v1269_v7 = vmul.f32 1.442695, %v1268_v1 }
 0x3a7   : > { %v1152_v44 = vpop.permute.xlu0 %1151 }
 0x3a8   : > { %v1157_v45 = vsel %vm1040_vm2, %v1152_v44, 0 }
 0x3a9   : > { %2400 = vmatpush3.bf16.msra.mxu1 %v1157_v45 }
 0x3aa   : > { %2411 = vmatprep.subr.bf16.mxu1 %v2759_v6 }
 0x43b   : > { %v1369_v46 = vpop.f32.mrf.mxu0 }
 0x43c   : > { %v1375_v55 = vmul.f32 0.125, %v1369_v46 }
 0x43d   : > { %v2421_v47 = vpop.f32.mrf.mxu0 }
 0x43e   : > { %v1376_v62 = vadd.f32 %v1375_v55, %v1262_v25  ;;  %v1281_v25 = vsel %vm1040_vm2, %v1206_v17, 0  ;;  %v2554_v47 = vld [vmem:[%s3001_s4] sm:$0xff]  }
 0x43f   : > { %v1372_v48 = vpop.f32.mrf.mxu0 }
 0x440   : > { %v1377_v0 = vsel %vm1024_vm3, %v1376_v62, -inf }
 0x441   : > { %v3165_v49 = vpop.f32.mrf.mxu1  ;;  %v2422_v50 = vpop.f32.mrf.mxu0 }
 0x443   : > { %v2391_v51 = vpop.f32.mrf.mxu1 }
 0x445   : > { %v1081_v52 = vpop.f32.mrf.mxu1 }
 0x447   : > { %v2392_v53 = vpop.f32.mrf.mxu1 }
 0x449   : > { %v1130_v54 = vpop.f32.mrf.mxu1 }
 0x44a   : > { %v1136_v56 = vmul.f32 0.125, %v1130_v54 }
 0x44b   : > { %v2397_v57 = vpop.f32.mrf.mxu1 }
 0x44c   : > { %v1137_v58 = vadd.f32 %v1136_v56, %v3138_v2 }
 0x44d   : > { %v1133_v59 = vpop.f32.mrf.mxu1 }
 0x44e   : > { %v1138_v60 = vsel %vm1024_vm3, %v1137_v58, -inf }
 0x44f   : > { %1139 = vmax.xlane.f32.xlu1 %v1138_v60  ;;  %v2398_v63 = vpop.f32.mrf.mxu1 }
 0x453   : > { %1378 = vmax.xlane.f32.xlu1 %v1377_v0  ;;  %v2241_v0 = vld [vmem:[%s3348_s25] ss:$0 sm:$0xff] }
 0x4d8   : > { %v1140_v3 = vpop.xlane.xlu1 %1139 }
 0x4d9   : > { %v1141_v4 = vsub.f32 %v1137_v58, %v1140_v3 }
 0x4db   : > { %v1142_v8 = vmul.f32 1.442695, %v1141_v4 }
 0x4dc   : > { %v1379_v9 = vpop.xlane.xlu1 %1378 }
 0x4dd   : > { %2599 = vpow2.f32 %v1142_v8  ;;  %v1380_v10 = vsub.f32 %v1376_v62, %v1379_v9 }
 0x4de   : > { %2601 = vpow2.f32 %v1269_v7 }
 0x4df   : > { %v1381_v11 = vmul.f32 1.442695, %v1380_v10 }
 0x4e1   : > { %2603 = vpow2.f32 %v1381_v11 }
 0x4ea   : > { %v2600_v2 = vpop.eup %2599 }
 0x4eb   : > { %v1144_v12 = vsel %vm1024_vm3, %v2600_v2, 0.0  ;;  %v2602_v13 = vpop.eup %2601 }
 0x4ec   : > { %1145 = vadd.xlane.f32.xlu1 %v1144_v12  ;;  %v1271_v14 = vsel %vm1024_vm3, %v2602_v13, 0.0 }
 0x4ee   : > { %v2604_v15 = vpop.eup %2603 }
 0x4ef   : > { %v1383_v16 = vsel %vm1024_vm3, %v2604_v15, 0.0 }
 0x4f0   : > { %1272 = vadd.xlane.f32.xlu1 %v1271_v14 }
 0x4f4   : > { %1384 = vadd.xlane.f32.xlu1 %v1383_v16 }
 0x505   : > { %1390 = vrot.lane.b32.xlu1 %v1206_v17, %s2761_s3 }
 0x575   : > { %v1146_v18 = vpop.xlane.xlu1 %1145 }
 0x576   : > { %2605 = vrcp.f32 %v1146_v18  ;;  %v2560_v18 = vld [vmem:[%s3033_s15 + $0x64] ss:$8 sps:$4 sm:$0xff]  }
 0x579   : > { %v1273_v19 = vpop.xlane.xlu1 %1272 }
 0x57a   : > { %2607 = vrcp.f32 %v1273_v19  ;;  %v2558_v19 = vld [vmem:[%s3033_s15 + $0x60] ss:$8 sps:$4 sm:$0xff]  }
 0x57d   : > { %v1385_v20 = vpop.xlane.xlu1 %1384 }
 0x57e   : > { %2609 = vrcp.f32 %v1385_v20  ;;  %v2563_v20 = vld [vmem:[%s3033_s15 + $0x54] ss:$8 sps:$4 sm:$0xff]  }
 0x581   : > { %v1391_v28 = vpop.permute.xlu1 %1390 }
 0x582   : > { %v1396_v31 = vsel %vm1040_vm2, %v1391_v28, 0  ;;  %v2570_v28 = vld [vmem:[%s3033_s15 + $0x20] ss:$8 sps:$4 sm:$0xff]  }
 0x583   : > { %v2606_v21 = vpop.eup %2605 }
 0x584   : > { %v1148_v22 = vmul.f32 %v2606_v21, %v2600_v2  ;;  %v2557_v2 = vld [vmem:[%s3033_s15 + $0x74] ss:$8 sps:$4 sm:$0xff]   ;;  %v2561_v21 = vld [vmem:[%s3033_s15 + $0x50] ss:$8 sps:$4 sm:$0xff]  }
 0x586   : > { %v1149_v23 = vpack.c.bf16 %v1148_v22, %v1148_v22  ;;  %v2564_v22 = vld [vmem:[%s3033_s15 + $0x40] ss:$8 sps:$4 sm:$0xff]  }
 0x587   : > { %v2608_v24 = vpop.eup %2607 }
 0x588   : > { %2402 = vmatmul.mubr.msk.bf16.vlgmr.msra.gmra.mxu1 %vm1024_vm3, %v1149_v23  ;;  %v1275_v61 = vmul.f32 %v2608_v24, %v2602_v13  ;;  %v2566_v23 = vld [vmem:[%s3033_s15 + $0x44] ss:$8 sps:$4 sm:$0xff]   ;;  %v2569_v24 = vld [vmem:[%s3033_s15 + $0x34] ss:$8 sps:$4 sm:$0xff]  }
 0x589   : > { %2412 = vmatpush3.bf16.msra.mxu1 %v1281_v25  ;;  %2413 = vmatprep.mubr.msk.bf16.mxu1 %vm2760_vm0, %v2759_v6  ;;  %v2567_v25 = vld [vmem:[%s3033_s15 + $0x30] ss:$8 sps:$4 sm:$0xff]  }
 0x58a   : > { %2423 = vmatprep.subr.bf16.mxu1 %v2759_v6  ;;  %v1276_v29 = vpack.c.bf16 %v1275_v61, %v1275_v61  ;;  %v2572_v61 = vld [vmem:[%s3033_s15 + $0x24] ss:$8 sps:$4 sm:$0xff]  }
 0x58b   : > { %v2610_v30 = vpop.eup %2609 }
 0x58c   : > { %v1387_v32 = vmul.f32 %v2610_v30, %v2604_v15  ;;  %v2573_v30 = vld [vmem:[%s3033_s15 + $0x10] ss:$8 sps:$4 sm:$0xff]  }
 0x58e   : > { %v1388_v36 = vpack.c.bf16 %v1387_v32, %v1387_v32  ;;  %v2576_v32 = vld [vmem:[%s3033_s15] ss:$8 sps:$4 sm:$0xff]  }
 0x590   : > { %2414 = vmatmul.mubr.msk.bf16.vlgmr.msra.gmra.mxu1 %vm1024_vm3, %v1276_v29  ;;  %v2575_v29 = vld [vmem:[%s3033_s15 + $0x14] ss:$8 sps:$4 sm:$0xff]  }
 0x591   : > { %2424 = vmatpush3.bf16.msra.mxu1 %v1396_v31  ;;  %2425 = vmatprep.mubr.msk.bf16.mxu1 %vm2760_vm0, %v2759_v6  ;;  %v2578_v31 = vld [vmem:[%s3033_s15 + $0x4] ss:$8 sps:$4 sm:$0xff]  }
 0x592   : > { %1708 = vmatprep.subr.bf16.mxu1 %v2557_v2 }
 0x598   : > { %2426 = vmatmul.mubr.msk.bf16.vlgmr.msra.gmra.mxu1 %vm1024_vm3, %v1388_v36 }
 0x599   : > { %1740 = vmatprep.mubr.bf16.mxu1 %v2758_v5  ;;  %v2552_v5 = vld [vmem:[%s3001_s4 + $0x10] sm:$0xff]  }
 0x59a   : > { %2440 = vmatpush3.bf16.msra.mxu0 %v2552_v5 }
 0x59b   : > { %2441 = vmatprep.subr.bf16.mxu0 %v2759_v6 }
 0x59e   : > { %2442 = vmatpush3.bf16.msra.mxu0 %v2553_v42 }
 0x59f   : > { %2443 = vmatprep.subr.bf16.mxu0 %v2759_v6 }
 0x5a2   : > { %2444 = vmatpush3.bf16.msra.mxu0 %v2554_v47  ;;  %v2251_v47 = vld [vmem:[%s3350_s1] ss:$0 sm:$0xff] }
 0x648   : > { %v1193_v43 = vpop.f32.mrf.mxu1 }
 0x64a   : > { %v2403_v44 = vpop.f32.mrf.mxu1 }
 0x64c   : > { %v1196_v45 = vpop.f32.mrf.mxu1 }
 0x64e   : > { %v2404_v46 = vpop.f32.mrf.mxu1 }
 0x650   : > { %v1317_v48 = vpop.f32.mrf.mxu1 }
 0x652   : > { %v2415_v50 = vpop.f32.mrf.mxu1 }
 0x654   : > { %v1320_v51 = vpop.f32.mrf.mxu1 }
 0x656   : > { %v2416_v52 = vpop.f32.mrf.mxu1 }
 0x658   : > { %v1432_v53 = vpop.f32.mrf.mxu1 }
 0x659   : > { %v2510_v54 = vpack.i.bf16 %v1432_v53, %v1193_v43  ;;  %v2579_v53 = vld [vmem:[%s3053_s20 + $0x78] sm:$0xff]  }
 0x65a   : > { %v2427_v55 = vpop.f32.mrf.mxu1  ;;  %2339 = vmatprep.subr.bf16.mxu0 %v2579_v53 }
 0x65b   : > { %2511 = vrot.lane.b32.xlu1 %v2510_v54, %s2761_s3  ;;  %v2580_v54 = vld [vmem:[%s3053_s20 + $0x38] sm:$0xff]   ;;  %v2581_v55 = vld [vmem:[%s3053_s20 + $0x70] sm:$0xff]  }
 0x65c   : > { %v1435_v56 = vpop.f32.mrf.mxu1 }
 0x65d   : > { %v2582_v56 = vld [vmem:[%s3053_s20 + $0x30] sm:$0xff]  }
 0x65e   : > { %v2428_v57 = vpop.f32.mrf.mxu1 }
 0x65f   : > { %v2583_v57 = vld [vmem:[%s3053_s20 + $0x68] sm:$0xff]  }
 0x6cd   : > { %v2512_v58 = vpop.permute.xlu1 %2511 }
 0x6ce   : > { %v2514_v6 = vunpack.i.h.bf16 %v2512_v58  ;;  %v2513_v59 = vunpack.i.l.bf16 %v2512_v58  ;;  %v2584_v58 = vld [vmem:[%s3053_s20 + $0x28] sm:$0xff]  }
 0x6d0   : > { %v1442_v60 = vsel %vm969_vm1, %v1317_v48, %v2514_v6  ;;  %v1203_v62 = vsel %vm969_vm1, %v3165_v49, %v2513_v59  ;;  %v2555_v49 = vld [vmem:[%s3033_s15 + $0x70] ss:$8 sps:$4 sm:$0xff]   ;;  %s3349_s15 = scalar_lea.vmem %s3304_s6, %s3009_s28 }
 0x6d1   : > { %v1459_v63 = vpack.c.bf16 %v1442_v60, %v1203_v62  ;;  %1709 = vmatpush1.bf16.msra.mxu1 %v2555_v49  ;;  %v2250_v43 = vld [vmem:[%s3349_s15] ss:$0 sm:$0xff]  ;;  %v2585_v6 = vld [vmem:[%s3053_s20 + $0x60] sm:$0xff]   ;;  %v2587_v60 = vld [vmem:[%s3053_s20 + $0x58] sm:$0xff]  }
 0x6d2   : > { %1710 = vmatprep.subr.bf16.mxu1 %v2560_v18  ;;  %v2586_v59 = vld [vmem:[%s3053_s20 + $0x20] sm:$0xff]   ;;  %v2588_v62 = vld [vmem:[%s3053_s20 + $0x18] sm:$0xff]  }
 0x6d3   : > { %2446 = vmatmul.mubr.bf16.vlgmr.msra.gmra.mxu0 %v1459_v63  ;;  %v2589_v63 = vld [vmem:[%s3053_s20 + $0x50] sm:$0xff]  }
 0x6d4   : > { %2340 = vmatpush3.bf16.msra.mxu0 %v2580_v54 }
 0x6d5   : > { %1711 = vmatpush1.bf16.msra.mxu1 %v2558_v19  ;;  %2341 = vmatprep.subr.bf16.mxu0 %v2581_v55 }
 0x6d6   : > { %1712 = vmatprep.subr.bf16.mxu1 %v2563_v20 }
 0x6d8   : > { %2342 = vmatpush3.bf16.msra.mxu0 %v2582_v56 }
 0x6d9   : > { %1713 = vmatpush1.bf16.msra.mxu1 %v2561_v21  ;;  %2343 = vmatprep.subr.bf16.mxu0 %v2583_v57  ;;  %v2268_v57 = vld [vmem:[%s681_s29] ss:$0 sm:$0xff] }
 0x6da   : > { %1714 = vmatprep.subr.bf16.mxu1 %v2566_v23 }
 0x6dc   : > { %2344 = vmatpush3.bf16.msra.mxu0 %v2584_v58 }
 0x6dd   : > { %1715 = vmatpush1.bf16.msra.mxu1 %v2564_v22  ;;  %2345 = vmatprep.subr.bf16.mxu0 %v2585_v6 }
 0x6de   : > { %1716 = vmatprep.subr.bf16.mxu1 %v2569_v24 }
 0x6e0   : > { %2346 = vmatpush3.bf16.msra.mxu0 %v2586_v59 }
 0x6e1   : > { %1717 = vmatpush1.bf16.msra.mxu1 %v2567_v25  ;;  %2347 = vmatprep.subr.bf16.mxu0 %v2587_v60 }
 0x6e2   : > { %1718 = vmatprep.subr.bf16.mxu1 %v2572_v61 }
 0x6e4   : > { %2348 = vmatpush3.bf16.msra.mxu0 %v2588_v62 }
 0x6e5   : > { %1719 = vmatpush1.bf16.msra.mxu1 %v2570_v28  ;;  %2349 = vmatprep.subr.bf16.mxu0 %v2589_v63 }
 0x6e6   : > { %1720 = vmatprep.subr.bf16.mxu1 %v2575_v29 }
 0x6e9   : > { %1721 = vmatpush1.bf16.msra.mxu1 %v2573_v30 }
 0x6ea   : > { %1722 = vmatprep.subr.bf16.mxu1 %v2578_v31 }
 0x6ed   : > { %1723 = vmatpush1.bf16.msra.mxu1 %v2576_v32 }
 0x793   : > { %v1549_v1 = vpop.f32.mrf.mxu0 }
 0x794   : > { %v1550_v3 = vadd.f32 %v2241_v0, %v1549_v1  ;;  %v2591_v1 = vld [vmem:[%s3053_s20 + $0x48] sm:$0xff]  }
 0x795   : > { %v2447_v4 = vpop.f32.mrf.mxu0 }
 0x796   : > { %v1556_v7 = vadd.f32 %v1550_v3, %v3085_v26  ;;  %v2592_v3 = vld [vmem:[%s3053_s20 + $0x8] sm:$0xff]   ;;  %v2593_v4 = vld [vmem:[%s3053_s20 + $0x40] sm:$0xff]  }
 0x797   : > { %v1552_v8 = vpop.f32.mrf.mxu0 }
 0x798   : > { %v1553_v9 = vadd.f32 %v2241_v0, %v1552_v8  ;;  %1560 = vadd.xlane.f32.xlu0 %v1556_v7  ;;  %v2590_v0 = vld [vmem:[%s3053_s20 + $0x10] sm:$0xff]  }
 0x799   : > { %v2448_v10 = vpop.f32.mrf.mxu0  ;;  %2350 = vmatpush3.bf16.msra.mxu0 %v2590_v0  ;;  %v1616_v8 = vld [vmem:[%s3039_s27] sm:$0x3] }
 0x79a   : > { %v1557_v11 = vadd.f32 %v1553_v9, %v3087_v27  ;;  %2351 = vmatprep.subr.bf16.mxu0 %v2591_v1  ;;  %v1621_v9 = vrot.slane %v1616_v8, %v3110_v35  ;;  %v1625_v10 = vrot.slane %v1616_v8, %v742_v34 }
 0x79c   : > { %1562 = vadd.xlane.f32.xlu1 %v1557_v11 }
 0x79d   : > { %2352 = vmatpush3.bf16.msra.mxu0 %v2592_v3 }
 0x79e   : > { %2353 = vmatprep.subr.bf16.mxu0 %v2593_v4 }
 0x821   : > { %v1561_v12 = vpop.xlane.xlu0 %1560 }
 0x822   : > { %v1565_v13 = vmul.f32 0.0078125, %v1561_v12 }
 0x824   : > { %v1567_v14 = vsub.f32 %v1556_v7, %v1565_v13  ;;  %v2594_v7 = vld [vmem:[%s3053_s20] sm:$0xff]  }
 0x825   : > { %v1563_v26 = vpop.xlane.xlu1 %1562  ;;  %2354 = vmatpush3.bf16.msra.mxu0 %v2594_v7 }
 0x826   : > { %v1566_v15 = vmul.f32 0.0078125, %v1563_v26  ;;  %v1569_v16 = vmul.f32 %v1567_v14, %v1567_v14 }
 0x828   : > { %v1568_v17 = vsub.f32 %v1557_v11, %v1566_v15  ;;  %1571 = vadd.xlane.f32.xlu0 %v1569_v16 }
 0x82a   : > { %v1570_v27 = vmul.f32 %v1568_v17, %v1568_v17 }
 0x82c   : > { %1573 = vadd.xlane.f32.xlu0 %v1570_v27 }
 0x8b1   : > { %v1572_v36 = vpop.xlane.xlu0 %1571 }
 0x8b2   : > { %v1575_v37 = vmul.f32 0.0078125, %v1572_v36 }
 0x8b4   : > { %v1577_v38 = vadd.f32 1e-12, %v1575_v37 }
 0x8b5   : > { %v1574_v39 = vpop.xlane.xlu0 %1573 }
 0x8b6   : > { %2611 = vrsqrt.f32 %v1577_v38  ;;  %v1576_v40 = vmul.f32 0.0078125, %v1574_v39 }
 0x8b8   : > { %v1578_v41 = vadd.f32 1e-12, %v1576_v40 }
 0x8ba   : > { %2613 = vrsqrt.f32 %v1578_v41 }
 0x8c3   : > { %v2612_v5 = vpop.eup %2611 }
 0x8c4   : > { %v1581_v42 = vmul.f32 %v2612_v5, %v1567_v14 }
 0x8c6   : > { %v1589_v46 = vmul.f32 %v2250_v43, %v1581_v42 }
 0x8c7   : > { %v2614_v44 = vpop.eup %2613 }
 0x8c8   : > { %v1582_v45 = vmul.f32 %v2614_v44, %v1568_v17  ;;  %v3239_v50 = vadd.f32 %v2251_v47, %v1589_v46 }
 0x8ca   : > { %v1590_v48 = vmul.f32 %v2250_v43, %v1582_v45 }
 0x8cc   : > { %v3241_v51 = vadd.f32 %v2251_v47, %v1590_v48 }
 0x8ce   : > { %v1615_v52 = vpack.c.bf16 %v3241_v51, %v3239_v50 }
 0x8d0   : > { %1741 = vmatmul.mubr.bf16.vlgmr.msra.gmra.mxu1 %v1615_v52 }
 0x990   : > { %v1742_v11 = vpop.f32.mrf.mxu1 }
 0x991   : > { %v1743_v49 = vadd.f32 %v1742_v11, %v1621_v9 }
 0x992   : > { %v1744_v2 = vpop.f32.mrf.mxu1 }
 0x993   : > { %v1755_v12 = vmul.f32 0.044715, %v1743_v49  ;;  %v1745_v13 = vadd.f32 %v1744_v2, %v1625_v10  ;;  %v1751_v46 = vmul.f32 0.5, %v1743_v49 }
 0x994   : > { %v1746_v14 = vpop.f32.mrf.mxu1 }
 0x995   : > { %v1759_v26 = vmul.f32 %v1755_v12, %v1743_v49  ;;  %v1756_v15 = vmul.f32 0.044715, %v1745_v13  ;;  %v1747_v16 = vadd.f32 %v1746_v14, %v1621_v9  ;;  %v1752_v43 = vmul.f32 0.5, %v1745_v13 }
 0x996   : > { %v1748_v17 = vpop.f32.mrf.mxu1 }
 0x997   : > { %v1763_v27 = vmul.f32 %v1759_v26, %v1743_v49  ;;  %v1760_v18 = vmul.f32 %v1756_v15, %v1745_v13  ;;  %v1757_v19 = vmul.f32 0.044715, %v1747_v16  ;;  %v1749_v20 = vadd.f32 %v1748_v17, %v1625_v10 }
 0x998   : > { %v1753_v5 = vmul.f32 0.5, %v1747_v16 }
 0x999   : > { %v1767_v21 = vadd.f32 %v1763_v27, %v1743_v49  ;;  %v1764_v22 = vmul.f32 %v1760_v18, %v1745_v13  ;;  %v1761_v35 = vmul.f32 %v1757_v19, %v1747_v16  ;;  %v1758_v23 = vmul.f32 0.044715, %v1749_v20  ;;  %v2286_v27 = vld [vmem:[%s687_s24] ss:$0 sm:$0xff] }
 0x99a   : > { %v1754_v44 = vmul.f32 0.5, %v1749_v20 }
 0x99b   : > { %v1765_v33 = vmul.f32 %v1761_v35, %v1747_v16  ;;  %v1762_v34 = vmul.f32 %v1758_v23, %v1749_v20  ;;  %v1768_v24 = vadd.f32 %v1764_v22, %v1745_v13  ;;  %v1771_v25 = vmul.f32 0.7978846, %v1767_v21 }
 0x99d   : > { %v1769_v61 = vadd.f32 %v1765_v33, %v1747_v16  ;;  %v1766_v28 = vmul.f32 %v1762_v34, %v1749_v20  ;;  %v1772_v29 = vmul.f32 0.7978846, %v1768_v24  ;;  %v2285_v16 = vld [vmem:[%s684_s14] ss:$0 sm:$0xff] }
 0x99f   : > { %v1773_v30 = vmul.f32 0.7978846, %v1769_v61  ;;  %v1770_v31 = vadd.f32 %v1766_v28, %v1749_v20  ;;  %2615 = vtanh.f32 %v1772_v29 }
 0x9a0   : > { %2617 = vtanh.f32 %v1771_v25 }
 0x9a1   : > { %2619 = vtanh.f32 %v1773_v30  ;;  %v1774_v32 = vmul.f32 0.7978846, %v1770_v31 }
 0x9a3   : > { %2621 = vtanh.f32 %v1774_v32 }
 0x9ac   : > { %v2616_v36 = vpop.eup %2615 }
 0x9ad   : > { %v2618_v37 = vpop.eup %2617  ;;  %v1780_v39 = vadd.f32 1.0, %v2616_v36 }
 0x9ae   : > { %v2620_v38 = vpop.eup %2619  ;;  %v1779_v42 = vadd.f32 1.0, %v2618_v37 }
 0x9af   : > { %v1781_v40 = vadd.f32 1.0, %v2620_v38  ;;  %v1784_v48 = vmul.f32 %v1780_v39, %v1752_v43 }
 0x9b0   : > { %v2622_v41 = vpop.eup %2621  ;;  %v1783_v53 = vmul.f32 %v1779_v42, %v1751_v46 }
 0x9b1   : > { %v1782_v45 = vadd.f32 1.0, %v2622_v41  ;;  %v1785_v47 = vmul.f32 %v1781_v40, %v1753_v5 }
 0x9b3   : > { %v1786_v52 = vmul.f32 %v1782_v45, %v1754_v44  ;;  %v1819_v55 = vpack.c.bf16 %v1785_v47, %v1783_v53 }
 0x9b5   : > { %v1820_v54 = vpack.c.bf16 %v1786_v52, %v1784_v48 }
 0x9b7   : > { %1956 = vmatprep.mubr.bf16.mxu0 %v1820_v54 }
 0x9b8   : > { %1957 = vmatmul.mubr.bf16.vlgmr.msra.gmra.mxu0 %v1819_v55 }
 0xa78   : > { %v2355_v56 = vpop.f32.mrf.mxu0 }
 0xa7a   : > { %v2356_v58 = vpop.f32.mrf.mxu0 }
 0xa7b   : > { %v2357_v6 = vadd.f32 %v2356_v58, %v2355_v56 }
 0xa7c   : > { %v2358_v59 = vpop.f32.mrf.mxu0 }
 0xa7d   : > { %v1959_v60 = vadd.f32 %v2357_v6, %v2268_v57 }
 0xa7e   : > { %v2359_v62 = vpop.f32.mrf.mxu0 }
 0xa7f   : > { %v2360_v63 = vadd.f32 %v2359_v62, %v2358_v59  ;;  %v1965_v0 = vadd.f32 %v1959_v60, %v3239_v50 }
 0xa81   : > { %v1962_v1 = vadd.f32 %v2360_v63, %v2268_v57  ;;  %1969 = vadd.xlane.f32.xlu1 %v1965_v0 }
 0xa83   : > { %v1966_v3 = vadd.f32 %v1962_v1, %v3241_v51 }
 0xa85   : > { %1971 = vadd.xlane.f32.xlu0 %v1966_v3 }
 0xb0a   : > { %v1970_v4 = vpop.xlane.xlu1 %1969 }
 0xb0b   : > { %v1973_v7 = vmul.f32 0.0078125, %v1970_v4 }
 0xb0d   : > { %v1975_v8 = vsub.f32 %v1965_v0, %v1973_v7 }
 0xb0e   : > { %v1972_v9 = vpop.xlane.xlu0 %1971 }
 0xb0f   : > { %v1974_v10 = vmul.f32 0.0078125, %v1972_v9  ;;  %v1977_v11 = vmul.f32 %v1975_v8, %v1975_v8 }
 0xb11   : > { %v1976_v49 = vsub.f32 %v1966_v3, %v1974_v10  ;;  %1979 = vadd.xlane.f32.xlu1 %v1977_v11 }
 0xb13   : > { %v1978_v2 = vmul.f32 %v1976_v49, %v1976_v49 }
 0xb15   : > { %1981 = vadd.xlane.f32.xlu0 %v1978_v2 }
 0xb9a   : > { %v1980_v12 = vpop.xlane.xlu1 %1979 }
 0xb9b   : > { %v1983_v13 = vmul.f32 0.0078125, %v1980_v12 }
 0xb9d   : > { %v1985_v50 = vadd.f32 1e-12, %v1983_v13 }
 0xb9e   : > { %v1982_v14 = vpop.xlane.xlu0 %1981 }
 0xb9f   : > { %2623 = vrsqrt.f32 %v1985_v50  ;;  %v1984_v26 = vmul.f32 0.0078125, %v1982_v14 }
 0xba1   : > { %v1986_v51 = vadd.f32 1e-12, %v1984_v26 }
 0xba3   : > { %2625 = vrsqrt.f32 %v1986_v51 }
 0xbac   : > { %v2624_v15 = vpop.eup %2623 }
 0xbad   : > { %v1989_v17 = vmul.f32 %v2624_v15, %v1975_v8 }
 0xbaf   : > { %v1997_v18 = vmul.f32 %v2285_v16, %v1989_v17 }
 0xbb0   : > { %v2626_v19 = vpop.eup %2625 }
 0xbb1   : > { %v2005_v20 = vadd.f32 %v2286_v27, %v1997_v18  ;;  %v1990_v21 = vmul.f32 %v2626_v19, %v1976_v49 }
 0xbb3   : > { %2007 = vst [vmem:[#allocation2] sm:$0xff] %v2005_v20  ;;  %v1998_v22 = vmul.f32 %v2285_v16, %v1990_v21 }
 0xbb5   : > { %v2006_v35 = vadd.f32 %v2286_v27, %v1998_v22 }
 0xbb7   : > { %2008 = vst [vmem:[#allocation2 + $0x8] sm:$0xff] %v2006_v35  ;;  %v2303_v23 = vpack.c.bf16 %v2006_v35, %v2005_v20 }
 0xbb9   : > { %2304 = vst [vmem:[%s3353_s13] sm:$0xff] %v2303_v23  }
 0xbba PF: > { %s3354_s16 = sld [smem:[#allocation11_spill]]  ;;  %s3357_s29 = smov %s2741_s30 }
 0xbbb   : > { %s3355_s14 = sld [smem:[#allocation10_spill]] }
 0xbbc   : > { %s3356_s15 = sld [smem:[#allocation12_spill]] }
 0xbc0   : > { %p27_p5 = scmp.ge.s32.totalorder %s3354_s16, 4  }
 0xbc1   : > { %s3358_s30 = smov %s3355_s14 }
 0xbc2   :  { %29 = sbr.rel (!%p27_p5) target bundleno = 15 (0xf), region = 168 }
 0xbc7   :  { %2030 = vsyncpa [#allocation4], 1 }
 0xbc8   :  { %2032 = vsyncpa [#allocation4 + $0x1], 1 }
 0xbc9   :  { %2033 = vsyncpa [#allocation6], 1 }
 0xbca   :  { %2035 = vsyncpa [#allocation6 + $0x1], 1 }

</bundles_post_ra>
